<compile_context>
chip_gen: v6e
topology: v6e:2x2x1
jax: 0.10.0
libtpu: 0.0.40
codegen_flags: <defaults>
</compile_context>

<pallas_src>
import functools

import jax
import jax.numpy as jnp
from jax.experimental import pallas as pl
from jax.experimental.pallas import tpu as pltpu


_LANE = 128   # vreg lane width
_SUB = 8      # f32 sublane count


def _round_up(x, m):
    return (x + m - 1) // m * m


# ----------------------------------------------------------------------------
# In-kernel helpers
# ----------------------------------------------------------------------------
def _combine_taps(P, coutp, Wp, npad):
    """Combine per-tap partial products into the 3x3-conv output.

    P: (9*coutp, npad) f32; block k = kh*3 + kw holds W[:, :, kh, kw] @ a,
    where a is the padded-flat input (Cin, npad).  The conv output at padded
    position q is sum_k P_k[:, q + d_k] with d_k = (kh-1)*Wp + (kw-1); the
    shift is done with pltpu.roll on the small aligned f32 blocks (XLU lane
    rotate) instead of slicing bf16 operands.  Wrapped lanes only land on
    halo / lane-padding columns, which the caller masks out.
    """
    acc = None
    for k in range(9):
        kh, kw = divmod(k, 3)
        d = (kh - 1) * Wp + (kw - 1)
        blk = P[k * coutp:(k + 1) * coutp, :]          # 8-sublane aligned slice
        if d != 0:
            blk = pltpu.roll(blk, (-d) % npad, axis=1)
        acc = blk if acc is None else acc + blk
    return acc


# ----------------------------------------------------------------------------
# Fused kernel: concat + conv1 + BN1 + ReLU + conv2 + BN2 + ReLU
# ----------------------------------------------------------------------------
def _up_fused_kernel(H, W, eps,
                     x2_ref, x1_ref, w1a_ref, w1b_ref, w2_ref,
                     b1_ref, b2_ref, g1_ref, be1_ref, g2_ref, be2_ref,
                     o_ref):
    N, coutp, npad = o_ref.shape
    Wp = W + 2

    # Interior mask (1.0 at real pixels, 0 at halos / lane padding), built
    # in-kernel from a lane iota.  Float multiply-by-1/Wp + floor is exact for
    # the lane indices used here (< 2^23), and avoids vector integer div.
    qf = jax.lax.broadcasted_iota(jnp.int32, (1, npad), 1).astype(jnp.float32)
    rowf = jnp.floor(qf * (1.0 / Wp))
    colf = qf - rowf * Wp
    maskN = jnp.where(
        (rowf >= 1.0) & (rowf <= float(H)) & (colf >= 1.0) & (colf <= float(W)),
        1.0, 0.0)                                              # (1, npad) f32
    cnt = float(N * H * W)

    w1a = w1a_ref[...]
    w1b = w1b_ref[...]
    w2 = w2_ref[...]
    b1 = b1_ref[...]
    b2 = b2_ref[...]

    # ---- conv1 (channel concat fused as two dots) + bias + BN1 batch stats.
    y1 = []
    s1 = jnp.zeros((coutp, 1), jnp.float32)
    q1 = jnp.zeros((coutp, 1), jnp.float32)
    for n in range(N):
        P = (jnp.dot(w1a, x2_ref[n], preferred_element_type=jnp.float32)
             + jnp.dot(w1b, x1_ref[n], preferred_element_type=jnp.float32))
        acc = (_combine_taps(P, coutp, Wp, npad) + b1) * maskN
        y1.append(acc)                                  # stays in f32 / VMEM
        s1 = s1 + jnp.sum(acc, axis=1, keepdims=True)
        q1 = q1 + jnp.sum(acc * acc, axis=1, keepdims=True)

    m1 = s1 * (1.0 / cnt)
    v1 = jnp.maximum(q1 * (1.0 / cnt) - m1 * m1, 0.0)   # biased variance
    sc1 = g1_ref[...] * jax.lax.rsqrt(v1 + eps)
    sh1 = be1_ref[...] - m1 * sc1

    # ---- BN1 + ReLU prologue, conv2 + bias + BN2 batch stats.
    y2 = []
    s2 = jnp.zeros((coutp, 1), jnp.float32)
    q2 = jnp.zeros((coutp, 1), jnp.float32)
    for n in range(N):
        a = jnp.maximum(y1[n] * sc1 + sh1, 0.0) * maskN   # re-zero halos
        P = jnp.dot(w2, a.astype(jnp.bfloat16),
                    preferred_element_type=jnp.float32)
        acc = (_combine_taps(P, coutp, Wp, npad) + b2) * maskN
        y2.append(acc)
        s2 = s2 + jnp.sum(acc, axis=1, keepdims=True)
        q2 = q2 + jnp.sum(acc * acc, axis=1, keepdims=True)

    m2 = s2 * (1.0 / cnt)
    v2 = jnp.maximum(q2 * (1.0 / cnt) - m2 * m2, 0.0)
    sc2 = g2_ref[...] * jax.lax.rsqrt(v2 + eps)
    sh2 = be2_ref[...] - m2 * sc2

    # ---- BN2 + ReLU, one aligned full-width store per image.
    for n in range(N):
        o_ref[n] = jnp.maximum(y2[n] * sc2 + sh2, 0.0) * maskN


# ----------------------------------------------------------------------------
# pallas_call wrapper
# ----------------------------------------------------------------------------
def _full_spec(shape):
    zeros = (0,) * len(shape)
    return pl.BlockSpec(shape, lambda n, _z=zeros: _z)


def up_pallas(x2p, x1p, w1a, w1b, w2m, b1, b2, g1, be1, g2, be2, H, W, eps):
    N, _, npad = x2p.shape
    coutp = b1.shape[0]
    args = (x2p, x1p, w1a, w1b, w2m, b1, b2, g1, be1, g2, be2)
    return pl.pallas_call(
        functools.partial(_up_fused_kernel, H, W, eps),
        out_shape=jax.ShapeDtypeStruct((N, coutp, npad), jnp.float32),
        grid=(1,),
        in_specs=[_full_spec(a.shape) for a in args],
        out_specs=_full_spec((N, coutp, npad)),
        compiler_params=pltpu.CompilerParams(
            dimension_semantics=("arbitrary",),
            vmem_limit_bytes=32 * 1024 * 1024,
        ),
    )(*args)


# ----------------------------------------------------------------------------
# Layout prep / glue
# ----------------------------------------------------------------------------
def _build_w9(w, coutp, cinp):
    """OIHW conv weight -> tap-major (9*coutp, cinp) bf16 matrix, channel
    padded so every tap block of the partials is an aligned 8-sublane slice."""
    out_ch, cin = w.shape[0], w.shape[1]
    w = jnp.transpose(w, (2, 3, 0, 1)).reshape(9, out_ch, cin)
    w = jnp.pad(w, ((0, 0), (0, coutp - out_ch), (0, cinp - cin)))
    return w.reshape(9 * coutp, cinp).astype(jnp.bfloat16)


def bilinear_upsample_2x_align_corners(x):
    N, C, H, W = x.shape
    Ho, Wo = 2 * H, 2 * W
    ys = jnp.arange(Ho, dtype=jnp.float32) * (H - 1) / (Ho - 1)
    xs = jnp.arange(Wo, dtype=jnp.float32) * (W - 1) / (Wo - 1)
    y0 = jnp.floor(ys).astype(jnp.int32)
    x0 = jnp.floor(xs).astype(jnp.int32)
    y1 = jnp.minimum(y0 + 1, H - 1)
    x1 = jnp.minimum(x0 + 1, W - 1)
    wy = (ys - y0.astype(jnp.float32))[None, None, :, None]
    wx = (xs - x0.astype(jnp.float32))[None, None, None, :]
    rows = x[:, :, y0, :] * (1.0 - wy) + x[:, :, y1, :] * wy
    return rows[:, :, :, x0] * (1.0 - wx) + rows[:, :, :, x1] * wx


def up_forward(x1, x2, params, eps=1e-5):
    N, C2, H, W = x2.shape
    C1 = x1.shape[1]
    out_ch = params["b1"].shape[0]
    Hp, Wp = H + 2, W + 2

    npad = _round_up(Hp * Wp, _LANE)       # 400 -> 512 lanes (128-aligned)
    c2p = _round_up(C2, _SUB)              # 4 -> 8 sublanes
    c1p = _round_up(C1, _SUB)
    coutp = _round_up(out_ch, _SUB)

    # Bilinear upsample of the decoder branch (tiny XLA gather glue).
    x1u = bilinear_upsample_2x_align_corners(x1)
    dY = H - x1u.shape[2]
    dX = W - x1u.shape[3]

    # Fold the F.pad-to-skip-size and the conv's 1-pixel halo into one pad,
    # then go to the channel/lane padded, lane-dense padded-flat bf16 layout.
    x1p4 = jnp.pad(
        x1u, ((0, 0), (0, 0),
              (1 + dY // 2, 1 + dY - dY // 2),
              (1 + dX // 2, 1 + dX - dX // 2)))
    x2p4 = jnp.pad(x2, ((0, 0), (0, 0), (1, 1), (1, 1)))

    def to_lane_dense(x, cpad):
        n, c, hp, wp = x.shape
        x = x.reshape(n, c, hp * wp)
        return jnp.pad(x, ((0, 0), (0, cpad - c),
                           (0, npad - hp * wp))).astype(jnp.bfloat16)

    x1pf = to_lane_dense(x1p4, c1p)
    x2pf = to_lane_dense(x2p4, c2p)

    # Conv weights: OIHW -> tap-major matrices; conv1 split along Cin so the
    # [x2, x1] channel concat never materializes.
    w1, w2 = params["w1"], params["w2"]
    w1a = _build_w9(w1[:, :C2], coutp, c2p)
    w1b = _build_w9(w1[:, C2:], coutp, c1p)
    w2m = _build_w9(w2, coutp, coutp)

    def pad_vec(v):
        return jnp.pad(v.astype(jnp.float32),
                       (0, coutp - out_ch)).reshape(coutp, 1)

    y = up_pallas(x2pf, x1pf, w1a, w1b, w2m,
                  pad_vec(params["b1"]), pad_vec(params["b2"]),
                  pad_vec(params["g1"]), pad_vec(params["be1"]),
                  pad_vec(params["g2"]), pad_vec(params["be2"]),
                  H, W, eps)                           # (N, coutp, npad) f32

    # Drop lane padding, padded channels and the 1-pixel halo (cheap XLA ops).
    y = y[:, :out_ch, :Hp * Wp].reshape(N, out_ch, Hp, Wp)
    return y[:, :, 1:1 + H, 1:1 + W]


# ----------------------------------------------------------------------------
# Pure-JAX f32 reference (training-mode BatchNorm), for a sanity check
# ----------------------------------------------------------------------------
def up_reference(x1, x2, params, eps=1e-5):
    N, C2, H, W = x2.shape
    x1u = bilinear_upsample_2x_align_corners(x1)
    dY = H - x1u.shape[2]
    dX = W - x1u.shape[3]
    x1p = jnp.pad(x1u, ((0, 0), (0, 0),
                        (dY // 2, dY - dY // 2), (dX // 2, dX - dX // 2)))
    x = jnp.concatenate([x2, x1p], axis=1)

    def conv_bn_relu(x, w, b, g, be):
        y = jax.lax.conv_general_dilated(
            x, w, window_strides=(1, 1), padding=((1, 1), (1, 1)),
            dimension_numbers=("NCHW", "OIHW", "NCHW"),
            precision=jax.lax.Precision.HIGHEST)
        y = y + b[None, :, None, None]
        m = jnp.mean(y, axis=(0, 2, 3), keepdims=True)
        v = jnp.mean((y - m) ** 2, axis=(0, 2, 3), keepdims=True)
        y = (y - m) * jax.lax.rsqrt(v + eps)
        y = y * g[None, :, None, None] + be[None, :, None, None]
        return jnp.maximum(y, 0.0)

    y = conv_bn_relu(x, params["w1"], params["b1"], params["g1"], params["be1"])
    y = conv_bn_relu(y, params["w2"], params["b2"], params["g2"], params["be2"])
    return y


def init_params(key, in_ch, out_ch):
    k1, k2, k3, k4 = jax.random.split(key, 4)
    # Conv weights stored in PyTorch OIHW layout.
    w1 = jax.random.normal(k1, (out_ch, in_ch, 3, 3), jnp.float32) * 0.1
    b1 = jax.random.normal(k2, (out_ch,), jnp.float32) * 0.05
    w2 = jax.random.normal(k3, (out_ch, out_ch, 3, 3), jnp.float32) * 0.1
    b2 = jax.random.normal(k4, (out_ch,), jnp.float32) * 0.05
    # BatchNorm default init: weight=1, bias=0.
    g1 = jnp.ones((out_ch,), jnp.float32)
    be1 = jnp.zeros((out_ch,), jnp.float32)
    g2 = jnp.ones((out_ch,), jnp.float32)
    be2 = jnp.zeros((out_ch,), jnp.float32)
    return dict(w1=w1, b1=b1, g1=g1, be1=be1,
                w2=w2, b2=b2, g2=g2, be2=be2)


if __name__ == "__main__":
    key = jax.random.PRNGKey(0)
    in_ch, out_ch = 8, 4            # up(in_ch=8, out_ch=4, bilinear=True)
    kx1, kx2, kp = jax.random.split(key, 3)

    # x1: decoder feature (to be upsampled), x2: skip connection.
    x1 = jax.random.normal(kx1, (2, in_ch // 2, 8, 8), jnp.float32)
    x2 = jax.random.normal(kx2, (2, in_ch // 2, 18, 18), jnp.float32)
    params = init_params(kp, in_ch, out_ch)

    out = jax.jit(up_forward)(x1, x2, params)
    jax.block_until_ready(out)
    assert out.shape == (2, out_ch, 18, 18)

    # Sanity check vs. the pure-JAX f32 reference; the kernel uses bf16 MXU
    # operands so expect ~1e-2-level agreement, far inside the 0.3 gate.
    ref = up_reference(x1, x2, params)
    err = float(jnp.max(jnp.abs(out - ref)))
    assert err < 0.3, f"kernel vs reference mismatch: max abs err {err}"
    print("KERNEL_OK")
</pallas_src>

<mosaic_0001>
module attributes {stable_mosaic.version = 11 : i64} {
  func.func @_up_fused_kernel(%arg0: i32, %arg1: memref<2x8x512xbf16, #tpu.memory_space<vmem>>, %arg2: memref<2x8x512xbf16, #tpu.memory_space<vmem>>, %arg3: memref<72x8xbf16, #tpu.memory_space<vmem>>, %arg4: memref<72x8xbf16, #tpu.memory_space<vmem>>, %arg5: memref<72x8xbf16, #tpu.memory_space<vmem>>, %arg6: memref<8x1xf32, #tpu.memory_space<vmem>>, %arg7: memref<8x1xf32, #tpu.memory_space<vmem>>, %arg8: memref<8x1xf32, #tpu.memory_space<vmem>>, %arg9: memref<8x1xf32, #tpu.memory_space<vmem>>, %arg10: memref<8x1xf32, #tpu.memory_space<vmem>>, %arg11: memref<8x1xf32, #tpu.memory_space<vmem>>, %arg12: memref<2x8x512xf32, #tpu.memory_space<vmem>>) attributes {dimension_semantics = [#tpu.dimension_semantics<arbitrary>], iteration_bounds = array<i64: 1>, scalar_prefetch = 0 : i64, scratch_operands = 0 : i64, tpu.core_type = #tpu.core_type<tc>, window_params = [{pipeline_mode = #tpu.pipeline_mode<synchronous>, transform_indices = @transform_0, window_bounds = array<i64: 2, 8, 512>}, {pipeline_mode = #tpu.pipeline_mode<synchronous>, transform_indices = @transform_1, window_bounds = array<i64: 2, 8, 512>}, {pipeline_mode = #tpu.pipeline_mode<synchronous>, transform_indices = @transform_2, window_bounds = array<i64: 72, 8>}, {pipeline_mode = #tpu.pipeline_mode<synchronous>, transform_indices = @transform_3, window_bounds = array<i64: 72, 8>}, {pipeline_mode = #tpu.pipeline_mode<synchronous>, transform_indices = @transform_4, window_bounds = array<i64: 72, 8>}, {pipeline_mode = #tpu.pipeline_mode<synchronous>, transform_indices = @transform_5, window_bounds = array<i64: 8, 1>}, {pipeline_mode = #tpu.pipeline_mode<synchronous>, transform_indices = @transform_6, window_bounds = array<i64: 8, 1>}, {pipeline_mode = #tpu.pipeline_mode<synchronous>, transform_indices = @transform_7, window_bounds = array<i64: 8, 1>}, {pipeline_mode = #tpu.pipeline_mode<synchronous>, transform_indices = @transform_8, window_bounds = array<i64: 8, 1>}, {pipeline_mode = #tpu.pipeline_mode<synchronous>, transform_indices = @transform_9, window_bounds = array<i64: 8, 1>}, {pipeline_mode = #tpu.pipeline_mode<synchronous>, transform_indices = @transform_10, window_bounds = array<i64: 8, 1>}, {pipeline_mode = #tpu.pipeline_mode<synchronous>, transform_indices = @transform_11, window_bounds = array<i64: 2, 8, 512>}]} {
    %0 = tpu.iota {dimensions = array<i32: 1>} : vector<1x512xi32>
    %1 = arith.sitofp %0 : vector<1x512xi32> to vector<1x512xf32>
    %cst = arith.constant 5.000000e-02 : f32
    %2 = vector.broadcast %cst : f32 to vector<1x512xf32>
    %3 = arith.mulf %1, %2 : vector<1x512xf32>
    %4 = math.floor %3 : vector<1x512xf32>
    %cst_0 = arith.constant 2.000000e+01 : f32
    %5 = vector.broadcast %cst_0 : f32 to vector<1x512xf32>
    %6 = arith.mulf %4, %5 : vector<1x512xf32>
    %7 = arith.subf %1, %6 : vector<1x512xf32>
    %cst_1 = arith.constant 1.000000e+00 : f32
    %8 = vector.broadcast %cst_1 : f32 to vector<1x512xf32>
    %9 = arith.cmpf oge, %4, %8 : vector<1x512xf32>
    %cst_2 = arith.constant 1.800000e+01 : f32
    %10 = vector.broadcast %cst_2 : f32 to vector<1x512xf32>
    %11 = arith.cmpf ole, %4, %10 : vector<1x512xf32>
    %12 = arith.andi %9, %11 : vector<1x512xi1>
    %cst_3 = arith.constant 1.000000e+00 : f32
    %13 = vector.broadcast %cst_3 : f32 to vector<1x512xf32>
    %14 = arith.cmpf oge, %7, %13 : vector<1x512xf32>
    %15 = arith.andi %12, %14 : vector<1x512xi1>
    %cst_4 = arith.constant 1.800000e+01 : f32
    %16 = vector.broadcast %cst_4 : f32 to vector<1x512xf32>
    %17 = arith.cmpf ole, %7, %16 : vector<1x512xf32>
    %18 = arith.andi %15, %17 : vector<1x512xi1>
    %cst_5 = arith.constant 1.000000e+00 : f32
    %cst_6 = arith.constant 0.000000e+00 : f32
    %19 = vector.broadcast %cst_5 : f32 to vector<1x512xf32>
    %20 = vector.broadcast %cst_6 : f32 to vector<1x512xf32>
    %21 = arith.select %18, %19, %20 : vector<1x512xi1>, vector<1x512xf32>
    %c0 = arith.constant 0 : index
    %c0_7 = arith.constant 0 : index
    %22 = vector.load %arg3[%c0, %c0_7] : memref<72x8xbf16, #tpu.memory_space<vmem>>, vector<72x8xbf16>
    %c0_8 = arith.constant 0 : index
    %c0_9 = arith.constant 0 : index
    %23 = vector.load %arg4[%c0_8, %c0_9] : memref<72x8xbf16, #tpu.memory_space<vmem>>, vector<72x8xbf16>
    %c0_10 = arith.constant 0 : index
    %c0_11 = arith.constant 0 : index
    %24 = vector.load %arg5[%c0_10, %c0_11] : memref<72x8xbf16, #tpu.memory_space<vmem>>, vector<72x8xbf16>
    %c0_12 = arith.constant 0 : index
    %c0_13 = arith.constant 0 : index
    %25 = vector.load %arg6[%c0_12, %c0_13] : memref<8x1xf32, #tpu.memory_space<vmem>>, vector<8x1xf32>
    %c0_14 = arith.constant 0 : index
    %c0_15 = arith.constant 0 : index
    %26 = vector.load %arg7[%c0_14, %c0_15] : memref<8x1xf32, #tpu.memory_space<vmem>>, vector<8x1xf32>
    %cst_16 = arith.constant 0.000000e+00 : f32
    %27 = vector.broadcast %cst_16 : f32 to vector<8x1xf32>
    %cst_17 = arith.constant 0.000000e+00 : f32
    %28 = vector.broadcast %cst_17 : f32 to vector<8x1xf32>
    %c0_18 = arith.constant 0 : index
    %c0_19 = arith.constant 0 : index
    %c0_20 = arith.constant 0 : index
    %29 = vector.load %arg1[%c0_18, %c0_19, %c0_20] : memref<2x8x512xbf16, #tpu.memory_space<vmem>>, vector<1x8x512xbf16>
    %30 = vector.shape_cast %29 : vector<1x8x512xbf16> to vector<8x512xbf16>
    %cst_21 = arith.constant dense<0.000000e+00> : vector<72x512xf32>
    %31 = tpu.matmul %22, %30, %cst_21 {dimension_numbers = #tpu.dot_dimension_numbers<[1], [0], [0], [1], [0, 0, 1, 1], [], []>} : vector<72x8xbf16>, vector<8x512xbf16>, vector<72x512xf32> -> vector<72x512xf32>
    %c0_22 = arith.constant 0 : index
    %c0_23 = arith.constant 0 : index
    %c0_24 = arith.constant 0 : index
    %32 = vector.load %arg2[%c0_22, %c0_23, %c0_24] : memref<2x8x512xbf16, #tpu.memory_space<vmem>>, vector<1x8x512xbf16>
    %33 = vector.shape_cast %32 : vector<1x8x512xbf16> to vector<8x512xbf16>
    %cst_25 = arith.constant dense<0.000000e+00> : vector<72x512xf32>
    %34 = tpu.matmul %23, %33, %cst_25 {dimension_numbers = #tpu.dot_dimension_numbers<[1], [0], [0], [1], [0, 0, 1, 1], [], []>} : vector<72x8xbf16>, vector<8x512xbf16>, vector<72x512xf32> -> vector<72x512xf32>
    %35 = arith.addf %31, %34 : vector<72x512xf32>
    %36 = vector.extract_strided_slice %35 {offsets = [0, 0], sizes = [8, 512], strides = [1, 1]} : vector<72x512xf32> to vector<8x512xf32>
    %c21_i32 = arith.constant 21 : i32
    %37 = tpu.dynamic_rotate %36 by %c21_i32 dim 1 : vector<8x512xf32>, i32 -> vector<8x512xf32>
    %38 = vector.extract_strided_slice %35 {offsets = [8, 0], sizes = [8, 512], strides = [1, 1]} : vector<72x512xf32> to vector<8x512xf32>
    %c20_i32 = arith.constant 20 : i32
    %39 = tpu.dynamic_rotate %38 by %c20_i32 dim 1 : vector<8x512xf32>, i32 -> vector<8x512xf32>
    %40 = arith.addf %37, %39 : vector<8x512xf32>
    %41 = vector.extract_strided_slice %35 {offsets = [16, 0], sizes = [8, 512], strides = [1, 1]} : vector<72x512xf32> to vector<8x512xf32>
    %c19_i32 = arith.constant 19 : i32
    %42 = tpu.dynamic_rotate %41 by %c19_i32 dim 1 : vector<8x512xf32>, i32 -> vector<8x512xf32>
    %43 = arith.addf %40, %42 : vector<8x512xf32>
    %44 = vector.extract_strided_slice %35 {offsets = [24, 0], sizes = [8, 512], strides = [1, 1]} : vector<72x512xf32> to vector<8x512xf32>
    %c1_i32 = arith.constant 1 : i32
    %45 = tpu.dynamic_rotate %44 by %c1_i32 dim 1 : vector<8x512xf32>, i32 -> vector<8x512xf32>
    %46 = arith.addf %43, %45 : vector<8x512xf32>
    %47 = vector.extract_strided_slice %35 {offsets = [32, 0], sizes = [8, 512], strides = [1, 1]} : vector<72x512xf32> to vector<8x512xf32>
    %48 = arith.addf %46, %47 : vector<8x512xf32>
    %49 = vector.extract_strided_slice %35 {offsets = [40, 0], sizes = [8, 512], strides = [1, 1]} : vector<72x512xf32> to vector<8x512xf32>
    %c511_i32 = arith.constant 511 : i32
    %50 = tpu.dynamic_rotate %49 by %c511_i32 dim 1 : vector<8x512xf32>, i32 -> vector<8x512xf32>
    %51 = arith.addf %48, %50 : vector<8x512xf32>
    %52 = vector.extract_strided_slice %35 {offsets = [48, 0], sizes = [8, 512], strides = [1, 1]} : vector<72x512xf32> to vector<8x512xf32>
    %c493_i32 = arith.constant 493 : i32
    %53 = tpu.dynamic_rotate %52 by %c493_i32 dim 1 : vector<8x512xf32>, i32 -> vector<8x512xf32>
    %54 = arith.addf %51, %53 : vector<8x512xf32>
    %55 = vector.extract_strided_slice %35 {offsets = [56, 0], sizes = [8, 512], strides = [1, 1]} : vector<72x512xf32> to vector<8x512xf32>
    %c492_i32 = arith.constant 492 : i32
    %56 = tpu.dynamic_rotate %55 by %c492_i32 dim 1 : vector<8x512xf32>, i32 -> vector<8x512xf32>
    %57 = arith.addf %54, %56 : vector<8x512xf32>
    %58 = vector.extract_strided_slice %35 {offsets = [64, 0], sizes = [8, 512], strides = [1, 1]} : vector<72x512xf32> to vector<8x512xf32>
    %c491_i32 = arith.constant 491 : i32
    %59 = tpu.dynamic_rotate %58 by %c491_i32 dim 1 : vector<8x512xf32>, i32 -> vector<8x512xf32>
    %60 = arith.addf %57, %59 : vector<8x512xf32>
    %61 = vector.broadcast %25 : vector<8x1xf32> to vector<8x512xf32>
    %62 = arith.addf %60, %61 : vector<8x512xf32>
    %63 = vector.broadcast %21 : vector<1x512xf32> to vector<8x512xf32>
    %64 = arith.mulf %62, %63 : vector<8x512xf32>
    %cst_26 = arith.constant dense<0.000000e+00> : vector<8xf32>
    %65 = vector.multi_reduction <add>, %64, %cst_26 [1] : vector<8x512xf32> to vector<8xf32>
    %66 = vector.shape_cast %65 : vector<8xf32> to vector<8x1xf32>
    %67 = arith.addf %27, %66 : vector<8x1xf32>
    %68 = arith.mulf %64, %64 : vector<8x512xf32>
    %cst_27 = arith.constant dense<0.000000e+00> : vector<8xf32>
    %69 = vector.multi_reduction <add>, %68, %cst_27 [1] : vector<8x512xf32> to vector<8xf32>
    %70 = vector.shape_cast %69 : vector<8xf32> to vector<8x1xf32>
    %71 = arith.addf %28, %70 : vector<8x1xf32>
    %c1 = arith.constant 1 : index
    %c0_28 = arith.constant 0 : index
    %c0_29 = arith.constant 0 : index
    %72 = vector.load %arg1[%c1, %c0_28, %c0_29] : memref<2x8x512xbf16, #tpu.memory_space<vmem>>, vector<1x8x512xbf16>
    %73 = vector.shape_cast %72 : vector<1x8x512xbf16> to vector<8x512xbf16>
    %cst_30 = arith.constant dense<0.000000e+00> : vector<72x512xf32>
    %74 = tpu.matmul %22, %73, %cst_30 {dimension_numbers = #tpu.dot_dimension_numbers<[1], [0], [0], [1], [0, 0, 1, 1], [], []>} : vector<72x8xbf16>, vector<8x512xbf16>, vector<72x512xf32> -> vector<72x512xf32>
    %c1_31 = arith.constant 1 : index
    %c0_32 = arith.constant 0 : index
    %c0_33 = arith.constant 0 : index
    %75 = vector.load %arg2[%c1_31, %c0_32, %c0_33] : memref<2x8x512xbf16, #tpu.memory_space<vmem>>, vector<1x8x512xbf16>
    %76 = vector.shape_cast %75 : vector<1x8x512xbf16> to vector<8x512xbf16>
    %cst_34 = arith.constant dense<0.000000e+00> : vector<72x512xf32>
    %77 = tpu.matmul %23, %76, %cst_34 {dimension_numbers = #tpu.dot_dimension_numbers<[1], [0], [0], [1], [0, 0, 1, 1], [], []>} : vector<72x8xbf16>, vector<8x512xbf16>, vector<72x512xf32> -> vector<72x512xf32>
    %78 = arith.addf %74, %77 : vector<72x512xf32>
    %79 = vector.extract_strided_slice %78 {offsets = [0, 0], sizes = [8, 512], strides = [1, 1]} : vector<72x512xf32> to vector<8x512xf32>
    %c21_i32_35 = arith.constant 21 : i32
    %80 = tpu.dynamic_rotate %79 by %c21_i32_35 dim 1 : vector<8x512xf32>, i32 -> vector<8x512xf32>
    %81 = vector.extract_strided_slice %78 {offsets = [8, 0], sizes = [8, 512], strides = [1, 1]} : vector<72x512xf32> to vector<8x512xf32>
    %c20_i32_36 = arith.constant 20 : i32
    %82 = tpu.dynamic_rotate %81 by %c20_i32_36 dim 1 : vector<8x512xf32>, i32 -> vector<8x512xf32>
    %83 = arith.addf %80, %82 : vector<8x512xf32>
    %84 = vector.extract_strided_slice %78 {offsets = [16, 0], sizes = [8, 512], strides = [1, 1]} : vector<72x512xf32> to vector<8x512xf32>
    %c19_i32_37 = arith.constant 19 : i32
    %85 = tpu.dynamic_rotate %84 by %c19_i32_37 dim 1 : vector<8x512xf32>, i32 -> vector<8x512xf32>
    %86 = arith.addf %83, %85 : vector<8x512xf32>
    %87 = vector.extract_strided_slice %78 {offsets = [24, 0], sizes = [8, 512], strides = [1, 1]} : vector<72x512xf32> to vector<8x512xf32>
    %c1_i32_38 = arith.constant 1 : i32
    %88 = tpu.dynamic_rotate %87 by %c1_i32_38 dim 1 : vector<8x512xf32>, i32 -> vector<8x512xf32>
    %89 = arith.addf %86, %88 : vector<8x512xf32>
    %90 = vector.extract_strided_slice %78 {offsets = [32, 0], sizes = [8, 512], strides = [1, 1]} : vector<72x512xf32> to vector<8x512xf32>
    %91 = arith.addf %89, %90 : vector<8x512xf32>
    %92 = vector.extract_strided_slice %78 {offsets = [40, 0], sizes = [8, 512], strides = [1, 1]} : vector<72x512xf32> to vector<8x512xf32>
    %c511_i32_39 = arith.constant 511 : i32
    %93 = tpu.dynamic_rotate %92 by %c511_i32_39 dim 1 : vector<8x512xf32>, i32 -> vector<8x512xf32>
    %94 = arith.addf %91, %93 : vector<8x512xf32>
    %95 = vector.extract_strided_slice %78 {offsets = [48, 0], sizes = [8, 512], strides = [1, 1]} : vector<72x512xf32> to vector<8x512xf32>
    %c493_i32_40 = arith.constant 493 : i32
    %96 = tpu.dynamic_rotate %95 by %c493_i32_40 dim 1 : vector<8x512xf32>, i32 -> vector<8x512xf32>
    %97 = arith.addf %94, %96 : vector<8x512xf32>
    %98 = vector.extract_strided_slice %78 {offsets = [56, 0], sizes = [8, 512], strides = [1, 1]} : vector<72x512xf32> to vector<8x512xf32>
    %c492_i32_41 = arith.constant 492 : i32
    %99 = tpu.dynamic_rotate %98 by %c492_i32_41 dim 1 : vector<8x512xf32>, i32 -> vector<8x512xf32>
    %100 = arith.addf %97, %99 : vector<8x512xf32>
    %101 = vector.extract_strided_slice %78 {offsets = [64, 0], sizes = [8, 512], strides = [1, 1]} : vector<72x512xf32> to vector<8x512xf32>
    %c491_i32_42 = arith.constant 491 : i32
    %102 = tpu.dynamic_rotate %101 by %c491_i32_42 dim 1 : vector<8x512xf32>, i32 -> vector<8x512xf32>
    %103 = arith.addf %100, %102 : vector<8x512xf32>
    %104 = vector.broadcast %25 : vector<8x1xf32> to vector<8x512xf32>
    %105 = arith.addf %103, %104 : vector<8x512xf32>
    %106 = vector.broadcast %21 : vector<1x512xf32> to vector<8x512xf32>
    %107 = arith.mulf %105, %106 : vector<8x512xf32>
    %cst_43 = arith.constant dense<0.000000e+00> : vector<8xf32>
    %108 = vector.multi_reduction <add>, %107, %cst_43 [1] : vector<8x512xf32> to vector<8xf32>
    %109 = vector.shape_cast %108 : vector<8xf32> to vector<8x1xf32>
    %110 = arith.addf %67, %109 : vector<8x1xf32>
    %111 = arith.mulf %107, %107 : vector<8x512xf32>
    %cst_44 = arith.constant dense<0.000000e+00> : vector<8xf32>
    %112 = vector.multi_reduction <add>, %111, %cst_44 [1] : vector<8x512xf32> to vector<8xf32>
    %113 = vector.shape_cast %112 : vector<8xf32> to vector<8x1xf32>
    %114 = arith.addf %71, %113 : vector<8x1xf32>
    %cst_45 = arith.constant 0.00154320989 : f32
    %115 = vector.broadcast %cst_45 : f32 to vector<8x1xf32>
    %116 = arith.mulf %110, %115 : vector<8x1xf32>
    %cst_46 = arith.constant 0.00154320989 : f32
    %117 = vector.broadcast %cst_46 : f32 to vector<8x1xf32>
    %118 = arith.mulf %114, %117 : vector<8x1xf32>
    %119 = arith.mulf %116, %116 : vector<8x1xf32>
    %120 = arith.subf %118, %119 : vector<8x1xf32>
    %cst_47 = arith.constant 0.000000e+00 : f32
    %121 = vector.broadcast %cst_47 : f32 to vector<8x1xf32>
    %122 = arith.maximumf %120, %121 : vector<8x1xf32>
    %c0_48 = arith.constant 0 : index
    %c0_49 = arith.constant 0 : index
    %123 = vector.load %arg8[%c0_48, %c0_49] : memref<8x1xf32, #tpu.memory_space<vmem>>, vector<8x1xf32>
    %cst_50 = arith.constant 9.99999974E-6 : f32
    %124 = vector.broadcast %cst_50 : f32 to vector<8x1xf32>
    %125 = arith.addf %122, %124 : vector<8x1xf32>
    %126 = math.rsqrt %125 : vector<8x1xf32>
    %127 = arith.mulf %123, %126 : vector<8x1xf32>
    %c0_51 = arith.constant 0 : index
    %c0_52 = arith.constant 0 : index
    %128 = vector.load %arg9[%c0_51, %c0_52] : memref<8x1xf32, #tpu.memory_space<vmem>>, vector<8x1xf32>
    %129 = arith.mulf %116, %127 : vector<8x1xf32>
    %130 = arith.subf %128, %129 : vector<8x1xf32>
    %cst_53 = arith.constant 0.000000e+00 : f32
    %131 = vector.broadcast %cst_53 : f32 to vector<8x1xf32>
    %cst_54 = arith.constant 0.000000e+00 : f32
    %132 = vector.broadcast %cst_54 : f32 to vector<8x1xf32>
    %133 = vector.broadcast %127 : vector<8x1xf32> to vector<8x512xf32>
    %134 = arith.mulf %64, %133 : vector<8x512xf32>
    %135 = vector.broadcast %130 : vector<8x1xf32> to vector<8x512xf32>
    %136 = arith.addf %134, %135 : vector<8x512xf32>
    %cst_55 = arith.constant 0.000000e+00 : f32
    %137 = vector.broadcast %cst_55 : f32 to vector<8x512xf32>
    %138 = arith.maximumf %136, %137 : vector<8x512xf32>
    %139 = vector.broadcast %21 : vector<1x512xf32> to vector<8x512xf32>
    %140 = arith.mulf %138, %139 : vector<8x512xf32>
    %141 = arith.truncf %140 : vector<8x512xf32> to vector<8x512xbf16>
    %cst_56 = arith.constant dense<0.000000e+00> : vector<72x512xf32>
    %142 = tpu.matmul %24, %141, %cst_56 {dimension_numbers = #tpu.dot_dimension_numbers<[1], [0], [0], [1], [0, 0, 1, 1], [], []>} : vector<72x8xbf16>, vector<8x512xbf16>, vector<72x512xf32> -> vector<72x512xf32>
    %143 = vector.extract_strided_slice %142 {offsets = [0, 0], sizes = [8, 512], strides = [1, 1]} : vector<72x512xf32> to vector<8x512xf32>
    %c21_i32_57 = arith.constant 21 : i32
    %144 = tpu.dynamic_rotate %143 by %c21_i32_57 dim 1 : vector<8x512xf32>, i32 -> vector<8x512xf32>
    %145 = vector.extract_strided_slice %142 {offsets = [8, 0], sizes = [8, 512], strides = [1, 1]} : vector<72x512xf32> to vector<8x512xf32>
    %c20_i32_58 = arith.constant 20 : i32
    %146 = tpu.dynamic_rotate %145 by %c20_i32_58 dim 1 : vector<8x512xf32>, i32 -> vector<8x512xf32>
    %147 = arith.addf %144, %146 : vector<8x512xf32>
    %148 = vector.extract_strided_slice %142 {offsets = [16, 0], sizes = [8, 512], strides = [1, 1]} : vector<72x512xf32> to vector<8x512xf32>
    %c19_i32_59 = arith.constant 19 : i32
    %149 = tpu.dynamic_rotate %148 by %c19_i32_59 dim 1 : vector<8x512xf32>, i32 -> vector<8x512xf32>
    %150 = arith.addf %147, %149 : vector<8x512xf32>
    %151 = vector.extract_strided_slice %142 {offsets = [24, 0], sizes = [8, 512], strides = [1, 1]} : vector<72x512xf32> to vector<8x512xf32>
    %c1_i32_60 = arith.constant 1 : i32
    %152 = tpu.dynamic_rotate %151 by %c1_i32_60 dim 1 : vector<8x512xf32>, i32 -> vector<8x512xf32>
    %153 = arith.addf %150, %152 : vector<8x512xf32>
    %154 = vector.extract_strided_slice %142 {offsets = [32, 0], sizes = [8, 512], strides = [1, 1]} : vector<72x512xf32> to vector<8x512xf32>
    %155 = arith.addf %153, %154 : vector<8x512xf32>
    %156 = vector.extract_strided_slice %142 {offsets = [40, 0], sizes = [8, 512], strides = [1, 1]} : vector<72x512xf32> to vector<8x512xf32>
    %c511_i32_61 = arith.constant 511 : i32
    %157 = tpu.dynamic_rotate %156 by %c511_i32_61 dim 1 : vector<8x512xf32>, i32 -> vector<8x512xf32>
    %158 = arith.addf %155, %157 : vector<8x512xf32>
    %159 = vector.extract_strided_slice %142 {offsets = [48, 0], sizes = [8, 512], strides = [1, 1]} : vector<72x512xf32> to vector<8x512xf32>
    %c493_i32_62 = arith.constant 493 : i32
    %160 = tpu.dynamic_rotate %159 by %c493_i32_62 dim 1 : vector<8x512xf32>, i32 -> vector<8x512xf32>
    %161 = arith.addf %158, %160 : vector<8x512xf32>
    %162 = vector.extract_strided_slice %142 {offsets = [56, 0], sizes = [8, 512], strides = [1, 1]} : vector<72x512xf32> to vector<8x512xf32>
    %c492_i32_63 = arith.constant 492 : i32
    %163 = tpu.dynamic_rotate %162 by %c492_i32_63 dim 1 : vector<8x512xf32>, i32 -> vector<8x512xf32>
    %164 = arith.addf %161, %163 : vector<8x512xf32>
    %165 = vector.extract_strided_slice %142 {offsets = [64, 0], sizes = [8, 512], strides = [1, 1]} : vector<72x512xf32> to vector<8x512xf32>
    %c491_i32_64 = arith.constant 491 : i32
    %166 = tpu.dynamic_rotate %165 by %c491_i32_64 dim 1 : vector<8x512xf32>, i32 -> vector<8x512xf32>
    %167 = arith.addf %164, %166 : vector<8x512xf32>
    %168 = vector.broadcast %26 : vector<8x1xf32> to vector<8x512xf32>
    %169 = arith.addf %167, %168 : vector<8x512xf32>
    %170 = vector.broadcast %21 : vector<1x512xf32> to vector<8x512xf32>
    %171 = arith.mulf %169, %170 : vector<8x512xf32>
    %cst_65 = arith.constant dense<0.000000e+00> : vector<8xf32>
    %172 = vector.multi_reduction <add>, %171, %cst_65 [1] : vector<8x512xf32> to vector<8xf32>
    %173 = vector.shape_cast %172 : vector<8xf32> to vector<8x1xf32>
    %174 = arith.addf %131, %173 : vector<8x1xf32>
    %175 = arith.mulf %171, %171 : vector<8x512xf32>
    %cst_66 = arith.constant dense<0.000000e+00> : vector<8xf32>
    %176 = vector.multi_reduction <add>, %175, %cst_66 [1] : vector<8x512xf32> to vector<8xf32>
    %177 = vector.shape_cast %176 : vector<8xf32> to vector<8x1xf32>
    %178 = arith.addf %132, %177 : vector<8x1xf32>
    %179 = vector.broadcast %127 : vector<8x1xf32> to vector<8x512xf32>
    %180 = arith.mulf %107, %179 : vector<8x512xf32>
    %181 = vector.broadcast %130 : vector<8x1xf32> to vector<8x512xf32>
    %182 = arith.addf %180, %181 : vector<8x512xf32>
    %cst_67 = arith.constant 0.000000e+00 : f32
    %183 = vector.broadcast %cst_67 : f32 to vector<8x512xf32>
    %184 = arith.maximumf %182, %183 : vector<8x512xf32>
    %185 = vector.broadcast %21 : vector<1x512xf32> to vector<8x512xf32>
    %186 = arith.mulf %184, %185 : vector<8x512xf32>
    %187 = arith.truncf %186 : vector<8x512xf32> to vector<8x512xbf16>
    %cst_68 = arith.constant dense<0.000000e+00> : vector<72x512xf32>
    %188 = tpu.matmul %24, %187, %cst_68 {dimension_numbers = #tpu.dot_dimension_numbers<[1], [0], [0], [1], [0, 0, 1, 1], [], []>} : vector<72x8xbf16>, vector<8x512xbf16>, vector<72x512xf32> -> vector<72x512xf32>
    %189 = vector.extract_strided_slice %188 {offsets = [0, 0], sizes = [8, 512], strides = [1, 1]} : vector<72x512xf32> to vector<8x512xf32>
    %c21_i32_69 = arith.constant 21 : i32
    %190 = tpu.dynamic_rotate %189 by %c21_i32_69 dim 1 : vector<8x512xf32>, i32 -> vector<8x512xf32>
    %191 = vector.extract_strided_slice %188 {offsets = [8, 0], sizes = [8, 512], strides = [1, 1]} : vector<72x512xf32> to vector<8x512xf32>
    %c20_i32_70 = arith.constant 20 : i32
    %192 = tpu.dynamic_rotate %191 by %c20_i32_70 dim 1 : vector<8x512xf32>, i32 -> vector<8x512xf32>
    %193 = arith.addf %190, %192 : vector<8x512xf32>
    %194 = vector.extract_strided_slice %188 {offsets = [16, 0], sizes = [8, 512], strides = [1, 1]} : vector<72x512xf32> to vector<8x512xf32>
    %c19_i32_71 = arith.constant 19 : i32
    %195 = tpu.dynamic_rotate %194 by %c19_i32_71 dim 1 : vector<8x512xf32>, i32 -> vector<8x512xf32>
    %196 = arith.addf %193, %195 : vector<8x512xf32>
    %197 = vector.extract_strided_slice %188 {offsets = [24, 0], sizes = [8, 512], strides = [1, 1]} : vector<72x512xf32> to vector<8x512xf32>
    %c1_i32_72 = arith.constant 1 : i32
    %198 = tpu.dynamic_rotate %197 by %c1_i32_72 dim 1 : vector<8x512xf32>, i32 -> vector<8x512xf32>
    %199 = arith.addf %196, %198 : vector<8x512xf32>
    %200 = vector.extract_strided_slice %188 {offsets = [32, 0], sizes = [8, 512], strides = [1, 1]} : vector<72x512xf32> to vector<8x512xf32>
    %201 = arith.addf %199, %200 : vector<8x512xf32>
    %202 = vector.extract_strided_slice %188 {offsets = [40, 0], sizes = [8, 512], strides = [1, 1]} : vector<72x512xf32> to vector<8x512xf32>
    %c511_i32_73 = arith.constant 511 : i32
    %203 = tpu.dynamic_rotate %202 by %c511_i32_73 dim 1 : vector<8x512xf32>, i32 -> vector<8x512xf32>
    %204 = arith.addf %201, %203 : vector<8x512xf32>
    %205 = vector.extract_strided_slice %188 {offsets = [48, 0], sizes = [8, 512], strides = [1, 1]} : vector<72x512xf32> to vector<8x512xf32>
    %c493_i32_74 = arith.constant 493 : i32
    %206 = tpu.dynamic_rotate %205 by %c493_i32_74 dim 1 : vector<8x512xf32>, i32 -> vector<8x512xf32>
    %207 = arith.addf %204, %206 : vector<8x512xf32>
    %208 = vector.extract_strided_slice %188 {offsets = [56, 0], sizes = [8, 512], strides = [1, 1]} : vector<72x512xf32> to vector<8x512xf32>
    %c492_i32_75 = arith.constant 492 : i32
    %209 = tpu.dynamic_rotate %208 by %c492_i32_75 dim 1 : vector<8x512xf32>, i32 -> vector<8x512xf32>
    %210 = arith.addf %207, %209 : vector<8x512xf32>
    %211 = vector.extract_strided_slice %188 {offsets = [64, 0], sizes = [8, 512], strides = [1, 1]} : vector<72x512xf32> to vector<8x512xf32>
    %c491_i32_76 = arith.constant 491 : i32
    %212 = tpu.dynamic_rotate %211 by %c491_i32_76 dim 1 : vector<8x512xf32>, i32 -> vector<8x512xf32>
    %213 = arith.addf %210, %212 : vector<8x512xf32>
    %214 = vector.broadcast %26 : vector<8x1xf32> to vector<8x512xf32>
    %215 = arith.addf %213, %214 : vector<8x512xf32>
    %216 = vector.broadcast %21 : vector<1x512xf32> to vector<8x512xf32>
    %217 = arith.mulf %215, %216 : vector<8x512xf32>
    %cst_77 = arith.constant dense<0.000000e+00> : vector<8xf32>
    %218 = vector.multi_reduction <add>, %217, %cst_77 [1] : vector<8x512xf32> to vector<8xf32>
    %219 = vector.shape_cast %218 : vector<8xf32> to vector<8x1xf32>
    %220 = arith.addf %174, %219 : vector<8x1xf32>
    %221 = arith.mulf %217, %217 : vector<8x512xf32>
    %cst_78 = arith.constant dense<0.000000e+00> : vector<8xf32>
    %222 = vector.multi_reduction <add>, %221, %cst_78 [1] : vector<8x512xf32> to vector<8xf32>
    %223 = vector.shape_cast %222 : vector<8xf32> to vector<8x1xf32>
    %224 = arith.addf %178, %223 : vector<8x1xf32>
    %cst_79 = arith.constant 0.00154320989 : f32
    %225 = vector.broadcast %cst_79 : f32 to vector<8x1xf32>
    %226 = arith.mulf %220, %225 : vector<8x1xf32>
    %cst_80 = arith.constant 0.00154320989 : f32
    %227 = vector.broadcast %cst_80 : f32 to vector<8x1xf32>
    %228 = arith.mulf %224, %227 : vector<8x1xf32>
    %229 = arith.mulf %226, %226 : vector<8x1xf32>
    %230 = arith.subf %228, %229 : vector<8x1xf32>
    %cst_81 = arith.constant 0.000000e+00 : f32
    %231 = vector.broadcast %cst_81 : f32 to vector<8x1xf32>
    %232 = arith.maximumf %230, %231 : vector<8x1xf32>
    %c0_82 = arith.constant 0 : index
    %c0_83 = arith.constant 0 : index
    %233 = vector.load %arg10[%c0_82, %c0_83] : memref<8x1xf32, #tpu.memory_space<vmem>>, vector<8x1xf32>
    %cst_84 = arith.constant 9.99999974E-6 : f32
    %234 = vector.broadcast %cst_84 : f32 to vector<8x1xf32>
    %235 = arith.addf %232, %234 : vector<8x1xf32>
    %236 = math.rsqrt %235 : vector<8x1xf32>
    %237 = arith.mulf %233, %236 : vector<8x1xf32>
    %c0_85 = arith.constant 0 : index
    %c0_86 = arith.constant 0 : index
    %238 = vector.load %arg11[%c0_85, %c0_86] : memref<8x1xf32, #tpu.memory_space<vmem>>, vector<8x1xf32>
    %239 = arith.mulf %226, %237 : vector<8x1xf32>
    %240 = arith.subf %238, %239 : vector<8x1xf32>
    %241 = vector.broadcast %237 : vector<8x1xf32> to vector<8x512xf32>
    %242 = arith.mulf %171, %241 : vector<8x512xf32>
    %243 = vector.broadcast %240 : vector<8x1xf32> to vector<8x512xf32>
    %244 = arith.addf %242, %243 : vector<8x512xf32>
    %cst_87 = arith.constant 0.000000e+00 : f32
    %245 = vector.broadcast %cst_87 : f32 to vector<8x512xf32>
    %246 = arith.maximumf %244, %245 : vector<8x512xf32>
    %247 = vector.broadcast %21 : vector<1x512xf32> to vector<8x512xf32>
    %248 = arith.mulf %246, %247 : vector<8x512xf32>
    %c0_88 = arith.constant 0 : index
    %c0_89 = arith.constant 0 : index
    %c0_90 = arith.constant 0 : index
    %249 = vector.load %arg12[%c0_88, %c0_89, %c0_90] : memref<2x8x512xf32, #tpu.memory_space<vmem>>, vector<1x8x512xf32>
    %250 = vector.shape_cast %249 : vector<1x8x512xf32> to vector<8x512xf32>
    %251 = vector.shape_cast %248 : vector<8x512xf32> to vector<1x8x512xf32>
    tpu.vector_store %arg12[%c0_88, %c0_89, %c0_90], %251 {strides = array<i32>} : memref<2x8x512xf32, #tpu.memory_space<vmem>>, vector<1x8x512xf32>,
    %252 = vector.broadcast %237 : vector<8x1xf32> to vector<8x512xf32>
    %253 = arith.mulf %217, %252 : vector<8x512xf32>
    %254 = vector.broadcast %240 : vector<8x1xf32> to vector<8x512xf32>
    %255 = arith.addf %253, %254 : vector<8x512xf32>
    %cst_91 = arith.constant 0.000000e+00 : f32
    %256 = vector.broadcast %cst_91 : f32 to vector<8x512xf32>
    %257 = arith.maximumf %255, %256 : vector<8x512xf32>
    %258 = vector.broadcast %21 : vector<1x512xf32> to vector<8x512xf32>
    %259 = arith.mulf %257, %258 : vector<8x512xf32>
    %c1_92 = arith.constant 1 : index
    %c0_93 = arith.constant 0 : index
    %c0_94 = arith.constant 0 : index
    %260 = vector.load %arg12[%c1_92, %c0_93, %c0_94] : memref<2x8x512xf32, #tpu.memory_space<vmem>>, vector<1x8x512xf32>
    %261 = vector.shape_cast %260 : vector<1x8x512xf32> to vector<8x512xf32>
    %262 = vector.shape_cast %259 : vector<8x512xf32> to vector<1x8x512xf32>
    tpu.vector_store %arg12[%c1_92, %c0_93, %c0_94], %262 {strides = array<i32>} : memref<2x8x512xf32, #tpu.memory_space<vmem>>, vector<1x8x512xf32>,
    return
  }
  func.func @transform_0(%arg0: i32) -> (i32, i32, i32) {
    %c0_i32 = arith.constant 0 : i32
    %c0_i32_0 = arith.constant 0 : i32
    %c0_i32_1 = arith.constant 0 : i32
    %c0_i32_2 = arith.constant 0 : i32
    return %c0_i32, %c0_i32_0, %c0_i32_1 : i32, i32, i32
  }
  func.func @transform_1(%arg0: i32) -> (i32, i32, i32) {
    %c0_i32 = arith.constant 0 : i32
    %c0_i32_0 = arith.constant 0 : i32
    %c0_i32_1 = arith.constant 0 : i32
    %c0_i32_2 = arith.constant 0 : i32
    return %c0_i32, %c0_i32_0, %c0_i32_1 : i32, i32, i32
  }
  func.func @transform_2(%arg0: i32) -> (i32, i32) {
    %c0_i32 = arith.constant 0 : i32
    %c0_i32_0 = arith.constant 0 : i32
    %c0_i32_1 = arith.constant 0 : i32
    return %c0_i32, %c0_i32_0 : i32, i32
  }
  func.func @transform_3(%arg0: i32) -> (i32, i32) {
    %c0_i32 = arith.constant 0 : i32
    %c0_i32_0 = arith.constant 0 : i32
    %c0_i32_1 = arith.constant 0 : i32
    return %c0_i32, %c0_i32_0 : i32, i32
  }
  func.func @transform_4(%arg0: i32) -> (i32, i32) {
    %c0_i32 = arith.constant 0 : i32
    %c0_i32_0 = arith.constant 0 : i32
    %c0_i32_1 = arith.constant 0 : i32
    return %c0_i32, %c0_i32_0 : i32, i32
  }
  func.func @transform_5(%arg0: i32) -> (i32, i32) {
    %c0_i32 = arith.constant 0 : i32
    %c0_i32_0 = arith.constant 0 : i32
    %c0_i32_1 = arith.constant 0 : i32
    return %c0_i32, %c0_i32_0 : i32, i32
  }
  func.func @transform_6(%arg0: i32) -> (i32, i32) {
    %c0_i32 = arith.constant 0 : i32
    %c0_i32_0 = arith.constant 0 : i32
    %c0_i32_1 = arith.constant 0 : i32
    return %c0_i32, %c0_i32_0 : i32, i32
  }
  func.func @transform_7(%arg0: i32) -> (i32, i32) {
    %c0_i32 = arith.constant 0 : i32
    %c0_i32_0 = arith.constant 0 : i32
    %c0_i32_1 = arith.constant 0 : i32
    return %c0_i32, %c0_i32_0 : i32, i32
  }
  func.func @transform_8(%arg0: i32) -> (i32, i32) {
    %c0_i32 = arith.constant 0 : i32
    %c0_i32_0 = arith.constant 0 : i32
    %c0_i32_1 = arith.constant 0 : i32
    return %c0_i32, %c0_i32_0 : i32, i32
  }
  func.func @transform_9(%arg0: i32) -> (i32, i32) {
    %c0_i32 = arith.constant 0 : i32
    %c0_i32_0 = arith.constant 0 : i32
    %c0_i32_1 = arith.constant 0 : i32
    return %c0_i32, %c0_i32_0 : i32, i32
  }
  func.func @transform_10(%arg0: i32) -> (i32, i32) {
    %c0_i32 = arith.constant 0 : i32
    %c0_i32_0 = arith.constant 0 : i32
    %c0_i32_1 = arith.constant 0 : i32
    return %c0_i32, %c0_i32_0 : i32, i32
  }
  func.func @transform_11(%arg0: i32) -> (i32, i32, i32) {
    %c0_i32 = arith.constant 0 : i32
    %c0_i32_0 = arith.constant 0 : i32
    %c0_i32_1 = arith.constant 0 : i32
    %c0_i32_2 = arith.constant 0 : i32
    return %c0_i32, %c0_i32_0, %c0_i32_1 : i32, i32, i32
  }
}

</mosaic_0001>

<bundles_post_ra>
// kernel: up_forward.1
= control target key start
LH: loop header
LB: loop body
LE: loop exit
PB: predicated region body
PF: predicated region fallthrough
CT: control target
= control target key end

     0   :  { %vm3673_vm0 = vcmask 1043456   ;;  %v3664_v2 = vmov 0   ;;  %vm3672_vm1 = vcmask 64512   ;;  %s2250_s13 = smov 20   ;;  %s2251_s14 = smov 19   ;;  %s3652_s1 = inlined_call_operand.vmem [shape: bf16[2,8,512], index: 1, kind: input, shape index: {}]   ;;  %s3653_s3 = inlined_call_operand.vmem [shape: bf16[72,8], index: 3, kind: input, shape index: {}]   ;;  %s3654_s0 = inlined_call_operand.vmem [shape: bf16[2,8,512], index: 0, kind: input, shape index: {}]   ;;  %s3655_s2 = inlined_call_operand.vmem [shape: bf16[72,8], index: 2, kind: input, shape index: {}]   ;;  %s3656_s5 = inlined_call_operand.vmem [shape: f32[8,1], index: 5, kind: input, shape index: {}]   ;;  %s3657_s7 = inlined_call_operand.vmem [shape: f32[8,1], index: 7, kind: input, shape index: {}]   ;;  %s3658_s8 = inlined_call_operand.vmem [shape: f32[8,1], index: 8, kind: input, shape index: {}]   ;;  %s3659_s6 = inlined_call_operand.vmem [shape: f32[8,1], index: 6, kind: input, shape index: {}]   ;;  %s3660_s4 = inlined_call_operand.vmem [shape: bf16[72,8], index: 4, kind: input, shape index: {}]   ;;  %s3661_s9 = inlined_call_operand.vmem [shape: f32[8,1], index: 9, kind: input, shape index: {}]   ;;  %s3662_s10 = inlined_call_operand.vmem [shape: f32[8,1], index: 10, kind: input, shape index: {}]   ;;  %s3663_s11 = inlined_call_operand.vmem [shape: f32[2,8,512], index: 11, kind: output, shape index: {}]  }
   0x1   :  { %v127_v0 = vld [vmem:[%s3652_s1] sm:$0xff]  ;;  %v128_v1 = vld [vmem:[%s3652_s1 + $0x8] sm:$0xff]  ;;  %223 = vmatprep.mubr.bf16.mxu0 %v3664_v2  ;;  %304 = vmatprep.mubr.bf16.mxu1 %v3664_v2  ;;  %v2134_v19 = vld [vmem:[%s3652_s1 + $0x10] sm:$0xff]  ;;  %s2252_s15 = smov 1   ;;  %s2254_s16 = smov 109  }
   0x2   :  { %v2096_v3 = vcombine.high %v127_v0, %v127_v0  ;;  %v2098_v4 = vcombine.high %v128_v1, %v128_v1  ;;  %v2095_v5 = vcombine.low %v127_v0, %v127_v0  ;;  %v2097_v6 = vcombine.low %v128_v1, %v128_v1  ;;  %2211 = vset.pattern.permute.xlu0 %v3664_v2  ;;  %v2335_v9 = vld [vmem:[%s3653_s3] sm:$0xff]   ;;  %v126_v11 = vld [vmem:[%s3654_s0 + $0x8] sm:$0xff]  ;;  %v2135_v20 = vld [vmem:[%s3652_s1 + $0x18] sm:$0xff]  ;;  %s2253_s1 = smov 127   ;;  %s2255_s17 = smov 108  }
   0x3   :  { %2212 = vset.pattern.permute.xlu1 %v3664_v2  ;;  %v125_v10 = vld [vmem:[%s3654_s0] sm:$0xff]  ;;  %v2119_v13 = vcombine.high %v126_v11, %v126_v11  ;;  %v2118_v15 = vcombine.low %v126_v11, %v126_v11  ;;  %v2356_v18 = vld [vmem:[%s3653_s3 + $0x8] sm:$0xff]   ;;  %v2137_v21 = vcombine.high %v2134_v19, %v2134_v19  ;;  %v2139_v22 = vcombine.high %v2135_v20, %v2135_v20  ;;  %v2375_v23 = vld [vmem:[%s3653_s3 + $0x10] sm:$0xff]   ;;  %s2256_s18 = smov 107  }
   0x4   :  { %2099 = vmatprep.subr.msk.bf16.mxu0 %vm3673_vm0, %v2096_v3  ;;  %2105 = vmatprep.subr.msk.bf16.mxu1 %vm3673_vm0, %v2098_v4  ;;  %v180_v7 = vsel %vm3673_vm0, %v2095_v5, 0  ;;  %v186_v8 = vsel %vm3673_vm0, %v2097_v6, 0  ;;  %v2117_v12 = vcombine.high %v125_v10, %v125_v10  ;;  %v2116_v14 = vcombine.low %v125_v10, %v125_v10  ;;  %v2386_v24 = vld [vmem:[%s3653_s3 + $0x18] sm:$0xff]   ;;  %v2397_v25 = vld [vmem:[%s3653_s3 + $0x20] ss:$0 sps:$4 sm:$0xff]   ;;  %v2132_v29 = vld [vmem:[%s3654_s0 + $0x10] sm:$0xff] }
   0x5   :  { %206 = vmatpush1.bf16.msra.mxu0 %v180_v7  ;;  %287 = vmatpush1.bf16.msra.mxu1 %v186_v8  ;;  %v408_v17 = vsel %vm3673_vm0, %v2118_v15, 0  ;;  %v2136_v26 = vcombine.low %v2134_v19, %v2134_v19  ;;  %v2138_v27 = vcombine.low %v2135_v20, %v2135_v20  ;;  %v2408_v28 = vld [vmem:[%s3655_s2] sm:$0xff]   ;;  %v2133_v30 = vld [vmem:[%s3654_s0 + $0x18] sm:$0xff]  ;;  %v2153_v33 = vcombine.high %v2132_v29, %v2132_v29  ;;  %v2227_v35 = vld [vmem:[%s3655_s2 + $0x8] sm:$0xff]  }
   0x6   :  { %v402_v16 = vsel %vm3673_vm0, %v2116_v14, 0  ;;  %2120 = vmatprep.subr.msk.bf16.mxu0 %vm3673_vm0, %v2117_v12  ;;  %2126 = vmatprep.subr.msk.bf16.mxu1 %vm3673_vm0, %v2119_v13  ;;  %v2155_v34 = vcombine.high %v2133_v30, %v2133_v30  ;;  %v2228_v36 = vld [vmem:[%s3655_s2 + $0x10] sm:$0xff]   ;;  %v2229_v37 = vld [vmem:[%s3655_s2 + $0x18] sm:$0xff]   ;;  %v2230_v38 = vld [vmem:[%s3655_s2 + $0x20] ss:$0 sps:$4 sm:$0xff]   ;;  %v2152_v39 = vcombine.low %v2132_v29, %v2132_v29  ;;  %v2154_v40 = vcombine.low %v2133_v30, %v2133_v30 }
   0x7   :  { %v757_v31 = vsel %vm3673_vm0, %v2136_v26, 0  ;;  %v763_v32 = vsel %vm3673_vm0, %v2138_v27, 0  ;;  %v123_v43 = vld [vmem:[%s3656_s5] sm:$0xff]  ;;  %s2249_s5 = smov 21  }
   0x8   :  { %2100 = vmatmul.mubr.msk.bf16.vlgmr.msra.gmra.mxu0 %vm3672_vm1, %v2335_v9  ;;  %2106 = vmatmul.mubr.msk.bf16.vlgmr.msra.gmra.mxu1 %vm3672_vm1, %v2335_v9  ;;  %v941_v41 = vsel %vm3673_vm0, %v2152_v39, 0  ;;  %v947_v42 = vsel %vm3673_vm0, %v2154_v40, 0 }
   0x9   :  { %233 = vmatprep.mubr.bf16.mxu0 %v3664_v2  ;;  %314 = vmatprep.mubr.bf16.mxu1 %v3664_v2 }
   0xa   :  { %428 = vmatpush1.bf16.msra.mxu0 %v402_v16  ;;  %509 = vmatpush1.bf16.msra.mxu1 %v408_v17 }
   0xb   :  { %2140 = vmatprep.subr.msk.bf16.mxu0 %vm3673_vm0, %v2137_v21  ;;  %2146 = vmatprep.subr.msk.bf16.mxu1 %vm3673_vm0, %v2139_v22 }
   0xc   :  { %713 = vperm.xlu0 %2211, %v123_v43  }
  0x10   :  { %2101 = vmatmul.mubr.msk.bf16.gmra.mxu0 %vm3672_vm1, %v2356_v18  ;;  %2107 = vmatmul.mubr.msk.bf16.gmra.mxu1 %vm3672_vm1, %v2356_v18 }
  0x11   :  { %243 = vmatprep.mubr.bf16.mxu0 %v3664_v2  ;;  %324 = vmatprep.mubr.bf16.mxu1 %v3664_v2 }
  0x18   :  { %2102 = vmatmul.mubr.msk.bf16.gmra.mxu0 %vm3672_vm1, %v2375_v23  ;;  %2108 = vmatmul.mubr.msk.bf16.gmra.mxu1 %vm3672_vm1, %v2375_v23 }
  0x19   :  { %253 = vmatprep.mubr.bf16.mxu0 %v3664_v2  ;;  %334 = vmatprep.mubr.bf16.mxu1 %v3664_v2 }
  0x20   :  { %2103 = vmatmul.mubr.msk.bf16.gmra.mxu0 %vm3672_vm1, %v2386_v24  ;;  %2109 = vmatmul.mubr.msk.bf16.gmra.mxu1 %vm3672_vm1, %v2386_v24 }
  0x21   :  { %263 = vmatprep.mubr.bf16.mxu0 %v3664_v2  ;;  %344 = vmatprep.mubr.bf16.mxu1 %v3664_v2 }
  0x28   :  { %2104 = vmatmul.mubr.msk.bf16.gmra.mxu0 %vm3672_vm1, %v2397_v25  ;;  %2110 = vmatmul.mubr.msk.bf16.gmra.mxu1 %vm3672_vm1, %v2397_v25 }
  0x29   :  { %445 = vmatprep.mubr.bf16.mxu0 %v3664_v2  ;;  %526 = vmatprep.mubr.bf16.mxu1 %v3664_v2 }
  0x30   :  { %2121 = vmatmul.mubr.msk.bf16.vlgmr.msra.gmra.mxu0 %vm3672_vm1, %v2408_v28  ;;  %2127 = vmatmul.mubr.msk.bf16.vlgmr.msra.gmra.mxu1 %vm3672_vm1, %v2408_v28 }
  0x31   :  { %455 = vmatprep.mubr.bf16.mxu0 %v3664_v2  ;;  %536 = vmatprep.mubr.bf16.mxu1 %v3664_v2 }
  0x32   :  { %783 = vmatpush1.bf16.msra.mxu0 %v757_v31  ;;  %864 = vmatpush1.bf16.msra.mxu1 %v763_v32 }
  0x33   :  { %2156 = vmatprep.subr.msk.bf16.mxu0 %vm3673_vm0, %v2153_v33  ;;  %2162 = vmatprep.subr.msk.bf16.mxu1 %vm3673_vm0, %v2155_v34 }
  0x38   :  { %2122 = vmatmul.mubr.msk.bf16.gmra.mxu0 %vm3672_vm1, %v2227_v35  ;;  %2128 = vmatmul.mubr.msk.bf16.gmra.mxu1 %vm3672_vm1, %v2227_v35 }
  0x39   :  { %465 = vmatprep.mubr.bf16.mxu0 %v3664_v2  ;;  %546 = vmatprep.mubr.bf16.mxu1 %v3664_v2 }
  0x40   :  { %2123 = vmatmul.mubr.msk.bf16.gmra.mxu0 %vm3672_vm1, %v2228_v36  ;;  %2129 = vmatmul.mubr.msk.bf16.gmra.mxu1 %vm3672_vm1, %v2228_v36 }
  0x41   :  { %475 = vmatprep.mubr.bf16.mxu0 %v3664_v2  ;;  %556 = vmatprep.mubr.bf16.mxu1 %v3664_v2 }
  0x48   :  { %2124 = vmatmul.mubr.msk.bf16.gmra.mxu0 %vm3672_vm1, %v2229_v37  ;;  %2130 = vmatmul.mubr.msk.bf16.gmra.mxu1 %vm3672_vm1, %v2229_v37 }
  0x49   :  { %485 = vmatprep.mubr.bf16.mxu0 %v3664_v2  ;;  %566 = vmatprep.mubr.bf16.mxu1 %v3664_v2 }
  0x50   :  { %2125 = vmatmul.mubr.msk.bf16.gmra.mxu0 %vm3672_vm1, %v2230_v38  ;;  %2131 = vmatmul.mubr.msk.bf16.gmra.mxu1 %vm3672_vm1, %v2230_v38 }
  0x51   :  { %800 = vmatprep.mubr.bf16.mxu0 %v3664_v2  ;;  %881 = vmatprep.mubr.bf16.mxu1 %v3664_v2 }
  0x58   :  { %2141 = vmatmul.mubr.msk.bf16.vlgmr.msra.gmra.mxu0 %vm3672_vm1, %v2335_v9  ;;  %2147 = vmatmul.mubr.msk.bf16.vlgmr.msra.gmra.mxu1 %vm3672_vm1, %v2335_v9 }
  0x59   :  { %810 = vmatprep.mubr.bf16.mxu0 %v3664_v2  ;;  %891 = vmatprep.mubr.bf16.mxu1 %v3664_v2 }
  0x5a   :  { %967 = vmatpush1.bf16.msra.mxu0 %v941_v41  ;;  %1048 = vmatpush1.bf16.msra.mxu1 %v947_v42 }
  0x60   :  { %2142 = vmatmul.mubr.msk.bf16.gmra.mxu0 %vm3672_vm1, %v2356_v18  ;;  %2148 = vmatmul.mubr.msk.bf16.gmra.mxu1 %vm3672_vm1, %v2356_v18 }
  0x61   :  { %820 = vmatprep.mubr.bf16.mxu0 %v3664_v2  ;;  %901 = vmatprep.mubr.bf16.mxu1 %v3664_v2 }
  0x68   :  { %2143 = vmatmul.mubr.msk.bf16.gmra.mxu0 %vm3672_vm1, %v2375_v23  ;;  %2149 = vmatmul.mubr.msk.bf16.gmra.mxu1 %vm3672_vm1, %v2375_v23 }
  0x69   :  { %830 = vmatprep.mubr.bf16.mxu0 %v3664_v2  ;;  %911 = vmatprep.mubr.bf16.mxu1 %v3664_v2 }
  0x70   :  { %2144 = vmatmul.mubr.msk.bf16.gmra.mxu0 %vm3672_vm1, %v2386_v24  ;;  %2150 = vmatmul.mubr.msk.bf16.gmra.mxu1 %vm3672_vm1, %v2386_v24 }
  0x71   :  { %840 = vmatprep.mubr.bf16.mxu0 %v3664_v2  ;;  %921 = vmatprep.mubr.bf16.mxu1 %v3664_v2 }
  0x78   :  { %2145 = vmatmul.mubr.msk.bf16.gmra.mxu0 %vm3672_vm1, %v2397_v25  ;;  %2151 = vmatmul.mubr.msk.bf16.gmra.mxu1 %vm3672_vm1, %v2397_v25 }
  0x79   :  { %984 = vmatprep.mubr.bf16.mxu0 %v3664_v2  ;;  %1065 = vmatprep.mubr.bf16.mxu1 %v3664_v2 }
  0x80   :  { %2157 = vmatmul.mubr.msk.bf16.vlgmr.msra.gmra.mxu0 %vm3672_vm1, %v2408_v28  ;;  %2163 = vmatmul.mubr.msk.bf16.vlgmr.msra.gmra.mxu1 %vm3672_vm1, %v2408_v28 }
  0x81   :  { %994 = vmatprep.mubr.bf16.mxu0 %v3664_v2  ;;  %1075 = vmatprep.mubr.bf16.mxu1 %v3664_v2 }
  0x88   :  { %2158 = vmatmul.mubr.msk.bf16.gmra.mxu0 %vm3672_vm1, %v2227_v35  ;;  %2164 = vmatmul.mubr.msk.bf16.gmra.mxu1 %vm3672_vm1, %v2227_v35 }
  0x89   :  { %1004 = vmatprep.mubr.bf16.mxu0 %v3664_v2  ;;  %1085 = vmatprep.mubr.bf16.mxu1 %v3664_v2 }
  0x90   :  { %2159 = vmatmul.mubr.msk.bf16.gmra.mxu0 %vm3672_vm1, %v2228_v36  ;;  %2165 = vmatmul.mubr.msk.bf16.gmra.mxu1 %vm3672_vm1, %v2228_v36 }
  0x91   :  { %1014 = vmatprep.mubr.bf16.mxu0 %v3664_v2  ;;  %1095 = vmatprep.mubr.bf16.mxu1 %v3664_v2 }
  0x98   :  { %2160 = vmatmul.mubr.msk.bf16.gmra.mxu0 %vm3672_vm1, %v2229_v37  ;;  %2166 = vmatmul.mubr.msk.bf16.gmra.mxu1 %vm3672_vm1, %v2229_v37 }
  0x99   :  { %1024 = vmatprep.mubr.bf16.mxu0 %v3664_v2  ;;  %1105 = vmatprep.mubr.bf16.mxu1 %v3664_v2 }
  0xa0   :  { %2161 = vmatmul.mubr.msk.bf16.gmra.mxu0 %vm3672_vm1, %v2230_v38  ;;  %2167 = vmatmul.mubr.msk.bf16.gmra.mxu1 %vm3672_vm1, %v2230_v38 }
  0xa1   :  { %1390 = vmatprep.mubr.bf16.mxu0 %v3664_v2  ;;  %1471 = vmatprep.mubr.bf16.mxu1 %v3664_v2 }
  0xc8   :  { %v225_v44 = vpop.f32.mrf.mxu0  ;;  %v306_v45 = vpop.f32.mrf.mxu1 }
  0xca   :  { %v227_v46 = vpop.f32.mrf.mxu0  ;;  %v308_v47 = vpop.f32.mrf.mxu1 }
  0xcc   :  { %v229_v48 = vpop.f32.mrf.mxu0  ;;  %v310_v49 = vpop.f32.mrf.mxu1 }
  0xce   :  { %v231_v50 = vpop.f32.mrf.mxu0  ;;  %v2511_v51 = vpop.f32.mrf.mxu1 }
  0xd0   :  { %v2513_v52 = vpop.f32.mrf.mxu0  ;;  %v2515_v53 = vpop.f32.mrf.mxu1 }
  0xd2   :  { %v2517_v54 = vpop.f32.mrf.mxu0  ;;  %v2519_v55 = vpop.f32.mrf.mxu1 }
  0xd4   :  { %v2521_v56 = vpop.f32.mrf.mxu0  ;;  %v2523_v57 = vpop.f32.mrf.mxu1 }
  0xd6   :  { %v2525_v58 = vpop.f32.mrf.mxu0  ;;  %v2527_v59 = vpop.f32.mrf.mxu1 }
  0xd8   :  { %v245_v60 = vpop.f32.mrf.mxu0  ;;  %v326_v61 = vpop.f32.mrf.mxu1 }
  0xda   :  { %v2529_v62 = vpop.f32.mrf.mxu0  ;;  %v2531_v63 = vpop.f32.mrf.mxu1 }
  0xdc   :  { %v2533_v0 = vpop.f32.mrf.mxu0  ;;  %v2535_v1 = vpop.f32.mrf.mxu1 }
  0xde   :  { %v2537_v3 = vpop.f32.mrf.mxu0  ;;  %v2539_v4 = vpop.f32.mrf.mxu1 }
  0xe0   :  { %v2541_v5 = vpop.f32.mrf.mxu0  ;;  %v2543_v6 = vpop.f32.mrf.mxu1 }
  0xe2   :  { %v2545_v7 = vpop.f32.mrf.mxu0  ;;  %v2547_v8 = vpop.f32.mrf.mxu1 }
  0xe4   :  { %v2549_v9 = vpop.f32.mrf.mxu0  ;;  %v2551_v10 = vpop.f32.mrf.mxu1 }
  0xe6   :  { %v2553_v11 = vpop.f32.mrf.mxu0  ;;  %v2555_v12 = vpop.f32.mrf.mxu1 }
  0xe8   :  { %v2557_v13 = vpop.f32.mrf.mxu0  ;;  %v2559_v14 = vpop.f32.mrf.mxu1 }
  0xea   :  { %v2561_v15 = vpop.f32.mrf.mxu0  ;;  %v2563_v16 = vpop.f32.mrf.mxu1 }
  0xec   :  { %v269_v17 = vpop.f32.mrf.mxu0  ;;  %v350_v18 = vpop.f32.mrf.mxu1 }
  0xee   :  { %v270_v19 = vpop.f32.mrf.mxu0  ;;  %v351_v20 = vpop.f32.mrf.mxu1 }
  0xf0   :  { %v447_v21 = vpop.f32.mrf.mxu0  ;;  %v528_v22 = vpop.f32.mrf.mxu1 }
  0xf1   :  { %v448_v23 = vadd.f32 %v447_v21, %v225_v44  ;;  %v529_v29 = vadd.f32 %v528_v22, %v306_v45 }
  0xf2   :  { %v449_v24 = vpop.f32.mrf.mxu0  ;;  %v530_v25 = vpop.f32.mrf.mxu1 }
  0xf3   :  { %v531_v26 = vadd.f32 %v530_v25, %v308_v47  ;;  %575 = vrot.lane.b32.xlu0 %v448_v23, %s2249_s5  ;;  %v450_v35 = vadd.f32 %v449_v24, %v227_v46 }
  0xf4   :  { %v451_v27 = vpop.f32.mrf.mxu0  ;;  %v532_v28 = vpop.f32.mrf.mxu1 }
  0xf5   :  { %581 = vrot.lane.b32.xlu1 %v531_v26, %s2249_s5  ;;  %v452_v32 = vadd.f32 %v451_v27, %v229_v48  ;;  %v533_v38 = vadd.f32 %v532_v28, %v310_v49 }
  0xf6   :  { %v453_v30 = vpop.f32.mrf.mxu0  ;;  %v534_v31 = vpop.f32.mrf.mxu1 }
  0xf7   :  { %579 = vrot.lane.b32.xlu0 %v529_v29, %s2249_s5  ;;  %v454_v41 = vadd.f32 %v453_v30, %v231_v50  ;;  %v535_v44 = vadd.f32 %v534_v31, %v2511_v51 }
  0xf8   :  { %v457_v33 = vpop.f32.mrf.mxu0  ;;  %v538_v34 = vpop.f32.mrf.mxu1 }
  0xf9   :  { %588 = vrot.lane.b32.xlu1 %v452_v32, %s2250_s13  ;;  %v458_v47 = vadd.f32 %v457_v33, %v2513_v52 }
  0xfa   :  { %v459_v36 = vpop.f32.mrf.mxu0  ;;  %v540_v37 = vpop.f32.mrf.mxu1 }
  0xfb   :  { %577 = vrot.lane.b32.xlu0 %v450_v35, %s2249_s5  ;;  %v460_v18 = vadd.f32 %v459_v36, %v2517_v54 }
  0xfc   :  { %v461_v39 = vpop.f32.mrf.mxu0  ;;  %v542_v40 = vpop.f32.mrf.mxu1 }
  0xfd   :  { %592 = vrot.lane.b32.xlu1 %v533_v38, %s2250_s13  ;;  %v462_v22 = vadd.f32 %v461_v39, %v2521_v56  ;;  %v543_v27 = vadd.f32 %v542_v40, %v2523_v57 }
  0xfe   :  { %v463_v42 = vpop.f32.mrf.mxu0  ;;  %v544_v43 = vpop.f32.mrf.mxu1 }
  0xff   :  { %590 = vrot.lane.b32.xlu0 %v454_v41, %s2250_s13  ;;  %v545_v25 = vadd.f32 %v544_v43, %v2527_v59  ;;  %v464_v31 = vadd.f32 %v463_v42, %v2525_v58 }
 0x100   :  { %v467_v45 = vpop.f32.mrf.mxu0  ;;  %v548_v46 = vpop.f32.mrf.mxu1 }
 0x101   :  { %v2574_v48 = vadd.f32 %v467_v45, %v245_v60  ;;  %v2576_v49 = vadd.f32 %v548_v46, %v326_v61  ;;  %594 = vrot.lane.b32.xlu1 %v535_v44, %s2250_s13  ;;  %v539_v61 = vadd.f32 %v538_v34, %v2515_v53 }
 0x102   :  { %v469_v17 = vpop.f32.mrf.mxu0  ;;  %v550_v50 = vpop.f32.mrf.mxu1 }
 0x103   :  { %v2581_v19 = vadd.f32 %v469_v17, %v2529_v62  ;;  %v2584_v51 = vadd.f32 %v550_v50, %v2531_v63  ;;  %605 = vrot.lane.b32.xlu0 %v458_v47, %s2251_s14  ;;  %v541_v63 = vadd.f32 %v540_v37, %v2519_v55 }
 0x104   :  { %v471_v52 = vpop.f32.mrf.mxu0  ;;  %v552_v60 = vpop.f32.mrf.mxu1 }
 0x105   :  { %607 = vrot.lane.b32.xlu1 %v460_v18, %s2251_s14  ;;  %v472_v35 = vadd.f32 %v471_v52, %v2533_v0 }
 0x106   :  { %v473_v20 = vpop.f32.mrf.mxu0  ;;  %v554_v21 = vpop.f32.mrf.mxu1 }
 0x107   :  { %609 = vrot.lane.b32.xlu0 %v539_v61, %s2251_s14  ;;  %v474_v55 = vadd.f32 %v473_v20, %v2537_v3  ;;  %v555_v42 = vadd.f32 %v554_v21, %v2539_v4 }
 0x108   :  { %v477_v54 = vpop.f32.mrf.mxu0  ;;  %v558_v62 = vpop.f32.mrf.mxu1 }
 0x109   :  { %622 = vrot.lane.b32.xlu1 %v462_v22, %s2252_s15  ;;  %v478_v57 = vadd.f32 %v477_v54, %v2541_v5  ;;  %v559_v37 = vadd.f32 %v558_v62, %v2543_v6 }
 0x10a   :  { %v479_v23 = vpop.f32.mrf.mxu0  ;;  %v560_v24 = vpop.f32.mrf.mxu1 }
 0x10b   :  { %611 = vrot.lane.b32.xlu0 %v541_v63, %s2251_s14  ;;  %v480_v46 = vadd.f32 %v479_v23, %v2545_v7  ;;  %v561_v18 = vadd.f32 %v560_v24, %v2547_v8 }
 0x10c   :  { %v481_v53 = vpop.f32.mrf.mxu0  ;;  %v562_v26 = vpop.f32.mrf.mxu1 }
 0x10d   :  { %628 = vrot.lane.b32.xlu1 %v545_v25, %s2252_s15  ;;  %v482_v40 = vadd.f32 %v481_v53, %v2549_v9  ;;  %v563_v44 = vadd.f32 %v562_v26, %v2551_v10 }
 0x10e   :  { %v483_v56 = vpop.f32.mrf.mxu0  ;;  %v2597_v28 = vpop.f32.mrf.mxu1 }
 0x10f   :  { %626 = vrot.lane.b32.xlu0 %v543_v27, %s2252_s15  ;;  %v484_v20 = vadd.f32 %v483_v56, %v2553_v11 }
 0x110   :  { %v487_v29 = vpop.f32.mrf.mxu0  ;;  %v568_v30 = vpop.f32.mrf.mxu1 }
 0x111   :  { %645 = vrot.lane.b32.xlu1 %v474_v55, %s2253_s1  ;;  %v488_v17 = vadd.f32 %v487_v29, %v2557_v13 }
 0x112   :  { %v2603_v59 = vpop.f32.mrf.mxu0  ;;  %v570_v32 = vpop.f32.mrf.mxu1 }
 0x113   :  { %v2607_v33 = vadd.f32 %v570_v32, %v2563_v16  ;;  %624 = vrot.lane.b32.xlu0 %v464_v31, %s2252_s15  ;;  %v553_v16 = vadd.f32 %v552_v60, %v2535_v1  ;;  %v569_v60 = vadd.f32 %v568_v30, %v2559_v14  ;;  %v565_v14 = vadd.f32 %v2597_v28, %v2555_v12 }
 0x114   :  { %v491_v3 = vpop.f32.mrf.mxu0  ;;  %v572_v34 = vpop.f32.mrf.mxu1  ;;  %v490_v24 = vadd.f32 %v2603_v59, %v2561_v15 }
 0x115   :  { %660 = vrot.lane.b32.xlu1 %v478_v57, %s2254_s16 }
 0x116   :  { %v492_v58 = vpop.f32.mrf.mxu0  ;;  %v573_v36 = vpop.f32.mrf.mxu1 }
 0x117   :  { %643 = vrot.lane.b32.xlu0 %v472_v35, %s2253_s1 }
 0x118   :  { %v2614_v38 = vpop.f32.mrf.mxu0  ;;  %v2616_v5 = vpop.f32.mrf.mxu1 }
 0x119   :  { %664 = vrot.lane.b32.xlu1 %v559_v37, %s2254_s16 }
 0x11a   :  { %v2620_v39 = vpop.f32.mrf.mxu0  ;;  %v2622_v0 = vpop.f32.mrf.mxu1 }
 0x11b   :  { %647 = vrot.lane.b32.xlu0 %v553_v16, %s2253_s1 }
 0x11c   :  { %v2626_v41 = vpop.f32.mrf.mxu0  ;;  %v2628_v6 = vpop.f32.mrf.mxu1 }
 0x11d   :  { %677 = vrot.lane.b32.xlu1 %v482_v40, %s2255_s17 }
 0x11e   :  { %v2632_v1 = vpop.f32.mrf.mxu0  ;;  %v2634_v43 = vpop.f32.mrf.mxu1 }
 0x11f   :  { %649 = vrot.lane.b32.xlu0 %v555_v42, %s2253_s1 }
 0x120   :  { %v2638_v9 = vpop.f32.mrf.mxu0  ;;  %v2640_v45 = vpop.f32.mrf.mxu1 }
 0x121   :  { %681 = vrot.lane.b32.xlu1 %v563_v44, %s2255_s17 }
 0x122   :  { %v2644_v4 = vpop.f32.mrf.mxu0  ;;  %v2646_v47 = vpop.f32.mrf.mxu1 }
 0x123   :  { %662 = vrot.lane.b32.xlu0 %v480_v46, %s2254_s16 }
 0x124   :  { %v2650_v50 = vpop.f32.mrf.mxu0  ;;  %v2652_v10 = vpop.f32.mrf.mxu1 }
 0x125   :  { %694 = vrot.lane.b32.xlu1 %v488_v17, %s2256_s18 }
 0x126   :  { %v2656_v7 = vpop.f32.mrf.mxu0  ;;  %v2658_v52 = vpop.f32.mrf.mxu1 }
 0x127   :  { %666 = vrot.lane.b32.xlu0 %v561_v18, %s2254_s16 }
 0x128   :  { %v2662_v13 = vpop.f32.mrf.mxu0  ;;  %v2664_v61 = vpop.f32.mrf.mxu1 }
 0x129   :  { %698 = vrot.lane.b32.xlu1 %v569_v60, %s2256_s18 }
 0x12a   :  { %v2668_v8 = vpop.f32.mrf.mxu0  ;;  %v2670_v21 = vpop.f32.mrf.mxu1 }
 0x12b   :  { %679 = vrot.lane.b32.xlu0 %v484_v20, %s2255_s17 }
 0x12c   :  { %v2673_v22 = vpop.f32.mrf.mxu0  ;;  %v2675_v54 = vpop.f32.mrf.mxu1 }
 0x12e   :  { %v2679_v62 = vpop.f32.mrf.mxu0  ;;  %v2681_v63 = vpop.f32.mrf.mxu1 }
 0x12f   :  { %683 = vrot.lane.b32.xlu0 %v565_v14, %s2255_s17 }
 0x130   :  { %v2684_v11 = vpop.f32.mrf.mxu0  ;;  %v2686_v23 = vpop.f32.mrf.mxu1 }
 0x132   :  { %v2690_v25 = vpop.f32.mrf.mxu0  ;;  %v2692_v53 = vpop.f32.mrf.mxu1 }
 0x133   :  { %696 = vrot.lane.b32.xlu0 %v490_v24, %s2256_s18 }
 0x134   :  { %v2695_v12 = vpop.f32.mrf.mxu0  ;;  %v2697_v26 = vpop.f32.mrf.mxu1 }
 0x136   :  { %v2699_v27 = vpop.f32.mrf.mxu0  ;;  %v2701_v56 = vpop.f32.mrf.mxu1 }
 0x138   :  { %v2703_v28 = vpop.f32.mrf.mxu0  ;;  %v2705_v55 = vpop.f32.mrf.mxu1 }
 0x13a   :  { %v2707_v29 = vpop.f32.mrf.mxu0  ;;  %v2709_v15 = vpop.f32.mrf.mxu1 }
 0x13c   :  { %v846_v30 = vpop.f32.mrf.mxu0  ;;  %v927_v31 = vpop.f32.mrf.mxu1 }
 0x13e   :  { %v847_v59 = vpop.f32.mrf.mxu0  ;;  %v928_v32 = vpop.f32.mrf.mxu1 }
 0x140   :  { %v986_v57 = vpop.f32.mrf.mxu0  ;;  %v1067_v3 = vpop.f32.mrf.mxu1 }
 0x141   :  { %v987_v34 = vadd.f32 %v986_v57, %v2614_v38  ;;  %v1068_v35 = vadd.f32 %v1067_v3, %v2616_v5 }
 0x142   :  { %v988_v58 = vpop.f32.mrf.mxu0  ;;  %v1069_v36 = vpop.f32.mrf.mxu1 }
 0x143   :  { %1118 = vrot.lane.b32.xlu1 %v1068_v35, %s2249_s5  ;;  %1114 = vrot.lane.b32.xlu0 %v987_v34, %s2249_s5  ;;  %v989_v40 = vadd.f32 %v988_v58, %v2620_v39  ;;  %v1070_v42 = vadd.f32 %v1069_v36, %v2622_v0 }
 0x144   :  { %v990_v37 = vpop.f32.mrf.mxu0  ;;  %v1071_v16 = vpop.f32.mrf.mxu1 }
 0x145   :  { %v991_v17 = vadd.f32 %v990_v37, %v2626_v41  ;;  %v1072_v18 = vadd.f32 %v1071_v16, %v2628_v6 }
 0x146   :  { %v992_v44 = vpop.f32.mrf.mxu0  ;;  %v1073_v46 = vpop.f32.mrf.mxu1 }
 0x147   :  { %1116 = vrot.lane.b32.xlu1 %v989_v40, %s2249_s5  ;;  %1120 = vrot.lane.b32.xlu0 %v1070_v42, %s2249_s5  ;;  %v993_v14 = vadd.f32 %v992_v44, %v2632_v1  ;;  %v1074_v24 = vadd.f32 %v1073_v46, %v2634_v43 }
 0x148   :  { %v996_v38 = vpop.f32.mrf.mxu0  ;;  %v1077_v5 = vpop.f32.mrf.mxu1 }
 0x149   :  { %v997_v59 = vadd.f32 %v996_v38, %v2638_v9  ;;  %v1078_v32 = vadd.f32 %v1077_v5, %v2640_v45 }
 0x14a   :  { %v998_v60 = vpop.f32.mrf.mxu0  ;;  %v1079_v20 = vpop.f32.mrf.mxu1 }
 0x14b   :  { %1126 = vrot.lane.b32.xlu1 %v991_v17, %s2250_s13  ;;  %1130 = vrot.lane.b32.xlu0 %v1072_v18, %s2250_s13  ;;  %v1080_v58 = vadd.f32 %v1079_v20, %v2646_v47 }
 0x14c   :  { %v1000_v39 = vpop.f32.mrf.mxu0  ;;  %v1081_v0 = vpop.f32.mrf.mxu1 }
 0x14d   :  { %v1082_v44 = vadd.f32 %v1081_v0, %v2652_v10 }
 0x14e   :  { %v1002_v30 = vpop.f32.mrf.mxu0  ;;  %v1083_v31 = vpop.f32.mrf.mxu1 }
 0x14f   :  { %1132 = vrot.lane.b32.xlu1 %v1074_v24, %s2250_s13  ;;  %1128 = vrot.lane.b32.xlu0 %v993_v14, %s2250_s13  ;;  %v1003_v16 = vadd.f32 %v1002_v30, %v2656_v7  ;;  %v1084_v18 = vadd.f32 %v1083_v31, %v2658_v52 }
 0x150   :  { %v1006_v41 = vpop.f32.mrf.mxu0  ;;  %v1087_v6 = vpop.f32.mrf.mxu1 }
 0x151   :  { %v2730_v57 = vadd.f32 %v1006_v41, %v2662_v13  ;;  %v2733_v3 = vadd.f32 %v1087_v6, %v2664_v61  ;;  %v999_v13 = vadd.f32 %v998_v60, %v2644_v4 }
 0x152   :  { %v1008_v1 = vpop.f32.mrf.mxu0  ;;  %v1089_v43 = vpop.f32.mrf.mxu1 }
 0x153   :  { %3678 = vst [vmem:[#allocation2_spill] sm:$0xff] %v2730_v57  ;;  %3679 = vst [vmem:[#allocation3_spill] sm:$0xff] %v2733_v3  ;;  %v2736_v34 = vadd.f32 %v1008_v1, %v2668_v8  ;;  %v2739_v35 = vadd.f32 %v1089_v43, %v2670_v21  ;;  %1142 = vrot.lane.b32.xlu1 %v997_v59, %s2251_s14  ;;  %1146 = vrot.lane.b32.xlu0 %v1078_v32, %s2251_s14 }
 0x154   :  { %v1010_v9 = vpop.f32.mrf.mxu0  ;;  %v1091_v45 = vpop.f32.mrf.mxu1  ;;  %v1001_v21 = vadd.f32 %v1000_v39, %v2650_v50 }
 0x155   :  { %3680 = vst [vmem:[#allocation4_spill] sm:$0xff] %v2736_v34  ;;  %3681 = vst [vmem:[#allocation5_spill] sm:$0xff] %v2739_v35  ;;  %v2755_v50 = vpop.permute.xlu0 %713  ;;  %v1011_v0 = vadd.f32 %v1010_v9, %v2673_v22  ;;  %v1092_v52 = vadd.f32 %v1091_v45, %v2675_v54 }
 0x156   :  { %v1012_v61 = vpop.f32.mrf.mxu0  ;;  %v1093_v36 = vpop.f32.mrf.mxu1 }
 0x157   :  { %1148 = vrot.lane.b32.xlu1 %v1080_v58, %s2251_s14  ;;  %1144 = vrot.lane.b32.xlu0 %v999_v13, %s2251_s14  ;;  %v1013_v46 = vadd.f32 %v1012_v61, %v2679_v62  ;;  %v1094_v60 = vadd.f32 %v1093_v36, %v2681_v63 }
 0x158   :  { %v1016_v8 = vpop.f32.mrf.mxu0  ;;  %v1097_v37 = vpop.f32.mrf.mxu1 }
 0x159   :  { %v1098_v54 = vadd.f32 %v1097_v37, %v2686_v23 }
 0x15a   :  { %v1018_v40 = vpop.f32.mrf.mxu0  ;;  %v1099_v42 = vpop.f32.mrf.mxu1 }
 0x15b   :  { %1158 = vrot.lane.b32.xlu1 %v1001_v21, %s2252_s15  ;;  %1160 = vrot.lane.b32.xlu0 %v1003_v16, %s2252_s15  ;;  %v1019_v14 = vadd.f32 %v1018_v40, %v2690_v25  ;;  %v1017_v25 = vadd.f32 %v1016_v8, %v2684_v11  ;;  %v1100_v11 = vadd.f32 %v1099_v42, %v2692_v53 }
 0x15c   :  { %v1020_v4 = vpop.f32.mrf.mxu0  ;;  %v1101_v47 = vpop.f32.mrf.mxu1 }
 0x15d   :  { %v1021_v23 = vadd.f32 %v1020_v4, %v2695_v12  ;;  %v1102_v13 = vadd.f32 %v1101_v47, %v2697_v26 }
 0x15e   :  { %v1022_v38 = vpop.f32.mrf.mxu0  ;;  %v1103_v5 = vpop.f32.mrf.mxu1 }
 0x15f   :  { %1162 = vrot.lane.b32.xlu1 %v1082_v44, %s2252_s15  ;;  %1180 = vrot.lane.b32.xlu0 %v1013_v46, %s2253_s1  ;;  %v1023_v63 = vadd.f32 %v1022_v38, %v2699_v27  ;;  %v1104_v59 = vadd.f32 %v1103_v5, %v2701_v56 }
 0x160   :  { %v1026_v7 = vpop.f32.mrf.mxu0  ;;  %v1107_v17 = vpop.f32.mrf.mxu1 }
 0x161   :  { %v1027_v58 = vadd.f32 %v1026_v7, %v2703_v28 }
 0x162   :  { %v1028_v20 = vpop.f32.mrf.mxu0  ;;  %v1109_v39 = vpop.f32.mrf.mxu1 }
 0x163   :  { %1164 = vrot.lane.b32.xlu1 %v1084_v18, %s2252_s15  ;;  %1184 = vrot.lane.b32.xlu0 %v1094_v60, %s2253_s1  ;;  %v1029_v27 = vadd.f32 %v1028_v20, %v2707_v29  ;;  %v1110_v26 = vadd.f32 %v1109_v39, %v2709_v15 }
 0x164   :  { %v1030_v10 = vpop.f32.mrf.mxu0  ;;  %v1111_v62 = vpop.f32.mrf.mxu1 }
 0x165   :  { %v2763_v24 = vpop.permute.xlu0 %575 }
 0x166   :  { %v1031_v30 = vpop.f32.mrf.mxu0  ;;  %v1112_v41 = vpop.f32.mrf.mxu1 }
 0x167   :  { %v2765_v6 = vpop.permute.xlu1 %581  ;;  %1178 = vrot.lane.b32.xlu1 %v1011_v0, %s2253_s1  ;;  %1196 = vrot.lane.b32.xlu0 %v1019_v14, %s2254_s16 }
 0x169   :  { %v2771_v31 = vpop.permute.xlu0 %579 }
 0x16b   :  { %1182 = vrot.lane.b32.xlu1 %v1092_v52, %s2253_s1  ;;  %v2774_v22 = vpop.permute.xlu1 %588  ;;  %1212 = vrot.lane.b32.xlu0 %v1023_v63, %s2255_s17 }
 0x16d   :  { %v2779_v32 = vpop.permute.xlu0 %577 }
 0x16f   :  { %1194 = vrot.lane.b32.xlu1 %v1017_v25, %s2254_s16  ;;  %v2782_v1 = vpop.permute.xlu1 %592  ;;  %1216 = vrot.lane.b32.xlu0 %v1104_v59, %s2255_s17 }
 0x171   :  { %v2787_v43 = vpop.permute.xlu0 %590 }
 0x173   :  { %1198 = vrot.lane.b32.xlu1 %v1098_v54, %s2254_s16  ;;  %1228 = vrot.lane.b32.xlu0 %v1029_v27, %s2256_s18  ;;  %v2792_v56 = vpop.permute.xlu1 %594 }
 0x175   :  { %v2794_v9 = vpop.permute.xlu0 %605 }
 0x177   :  { %1200 = vrot.lane.b32.xlu1 %v1100_v11, %s2254_s16  ;;  %700 = vrot.lane.b32.xlu0 %v2607_v33, %s2256_s18  ;;  %v2802_v45 = vpop.permute.xlu1 %607  ;;  %v1108_v33 = vadd.f32 %v1107_v17, %v2705_v55  ;;  %v39_v17 = vlaneseq }
 0x179   :  { %v2800_v29 = vpop.permute.xlu0 %609  ;;  %v2857_v20 = vand.u32 127, %v39_v17 }
 0x17b   :  { %1210 = vrot.lane.b32.xlu1 %v1021_v23, %s2255_s17  ;;  %v2810_v61 = vpop.permute.xlu1 %622  ;;  %v41_v62 = vadd.s32 128, %v2857_v20  ;;  %v44_v30 = vcvt.s32.f32 %v2857_v20  ;;  %v2870_v52 = vadd.s32 256, %v2857_v20  ;;  %v2873_v63 = vadd.s32 384, %v2857_v20 }
 0x17c   :  { %vm583_vm2 = vcmp.lt.s32.totalorder %v2857_v20, 21  ;;  %vm596_vm3 = vcmp.lt.s32.totalorder %v2857_v20, 20  ;;  %vm3677_vm4 = vcmp.lt.s32.totalorder %v2857_v20, 19  ;;  %vm3676_vm5 = vcmp.lt.s32.totalorder %v2857_v20, 1 }
 0x17d   :  { %v2806_v53 = vpop.permute.xlu0 %611  ;;  %v45_v41 = vcvt.s32.f32 %v41_v62  ;;  %v48_v54 = vmul.f32 0.05, %v44_v30  ;;  %v46_v11 = vcvt.s32.f32 %v2870_v52  ;;  %v47_v23 = vcvt.s32.f32 %v2873_v63 }
 0x17e   :  { %v600_v17 = vsel %vm596_vm3, %v2792_v56, %v2774_v22  ;;  %v587_v63 = vsel %vm583_vm2, %v2765_v6, %v2763_v24  ;;  %vm3674_vm6 = vcmp.lt.s32.totalorder %v2857_v20, 127  ;;  %vm668_vm7 = vcmp.lt.s32.totalorder %v2857_v20, 109 }
 0x17f   :  { %1214 = vrot.lane.b32.xlu1 %v1102_v13, %s2255_s17  ;;  %v2818_v8 = vpop.permute.xlu1 %628  ;;  %v49_v27 = vmul.f32 0.05, %v45_v41  ;;  %v50_v62 = vmul.f32 0.05, %v46_v11  ;;  %v51_v52 = vmul.f32 0.05, %v47_v23  ;;  %v601_v35 = vadd.f32 %v600_v17, %v587_v63 }
 0x180   :  { %v634_v17 = vsel %vm3676_vm5, %v2818_v8, %v2810_v61  ;;  %vm685_vm8 = vcmp.lt.s32.totalorder %v2857_v20, 108  ;;  %vm3675_vm15 = vcmp.lt.s32.totalorder %v2857_v20, 107 }
 0x181   :  { %v2812_v36 = vpop.permute.xlu0 %626 }
 0x183   :  { %1226 = vrot.lane.b32.xlu1 %v1027_v58, %s2256_s18  ;;  %v2825_v28 = vpop.permute.xlu1 %645 }
 0x185   :  { %v2816_v12 = vpop.permute.xlu0 %624 }
 0x187   :  { %1230 = vrot.lane.b32.xlu1 %v1108_v33, %s2256_s18  ;;  %v2829_v16 = vpop.permute.xlu1 %660  ;;  %v52_v33 = vfloor.f32 %v48_v54  ;;  %v599_v54 = vsel %vm596_vm3, %v2774_v22, %v2787_v43  ;;  %v616_v22 = vsel %vm3677_vm4, %v2794_v9, %v2802_v45 }
 0x189   :  { %v2822_v37 = vpop.permute.xlu0 %643  ;;  %v56_v34 = vmul.f32 20.0, %v52_v33  ;;  %vm64_vm9 = vcmp.ge.f32.partialorder %v52_v33, 1.0  ;;  %vm68_vm11 = vcmp.le.f32.partialorder %v52_v33, 18.0 }
 0x18b   :  { %1232 = vrot.lane.b32.xlu1 %v1110_v26, %s2256_s18  ;;  %v2833_v55 = vpop.permute.xlu1 %664  ;;  %v53_v26 = vfloor.f32 %v49_v27  ;;  %v617_v27 = vsel %vm3677_vm4, %v2806_v53, %v2794_v9 }
 0x18d   :  { %v2827_v21 = vpop.permute.xlu0 %647  ;;  %v57_v57 = vmul.f32 20.0, %v53_v26  ;;  %vm65_vm10 = vcmp.ge.f32.partialorder %v53_v26, 1.0  ;;  %vm69_vm12 = vcmp.le.f32.partialorder %v53_v26, 18.0 }
 0x18f   :  { %v2837_v4 = vpop.permute.xlu1 %677 }
 0x191   :  { %v2831_v40 = vpop.permute.xlu0 %649 }
 0x193   :  { %v2841_v15 = vpop.permute.xlu1 %681 }
 0x195   :  { %v2835_v42 = vpop.permute.xlu0 %662 }
 0x197   :  { %v2845_v46 = vpop.permute.xlu1 %694 }
 0x199   :  { %v2839_v47 = vpop.permute.xlu0 %666 }
 0x19b   :  { %v2849_v5 = vpop.permute.xlu1 %698 }
 0x19d   :  { %v2843_v44 = vpop.permute.xlu0 %679 }
 0x1a1   :  { %v2847_v38 = vpop.permute.xlu0 %683 }
 0x1a5   :  { %v2851_v7 = vpop.permute.xlu0 %696 }
 0x1b5   :  { %v2853_v18 = vpop.permute.xlu1 %1118  ;;  %v2855_v60 = vpop.permute.xlu0 %1114 }
 0x1b6   :  { %3682 = vst [vmem:[#allocation6_spill] sm:$0xff] %v2853_v18  ;;  %v618_v18 = vadd.f32 %v617_v27, %v601_v35  ;;  %v60_v35 = vsub.f32 %v44_v30, %v56_v34  ;;  %v653_v34 = vsel %vm3674_vm6, %v2825_v28, %v2827_v21 }
 0x1b8   :  { %vm76_vm13 = vcmp.ge.f32.partialorder %v60_v35, 1.0  ;;  %vm84_vm1 = vcmp.le.f32.partialorder %v60_v35, 18.0  ;;  %v2257_v35 = vmov 0.0  }
 0x1b9   :  { %v2859_v39 = vpop.permute.xlu1 %1116  ;;  %v2861_v10 = vpop.permute.xlu0 %1120 }
 0x1ba   :  { %3683 = vst [vmem:[#allocation7_spill] sm:$0xff] %v2859_v39  ;;  %v2917_v39 = vfloor.f32 %v50_v62  ;;  %v635_v62 = vadd.f32 %v634_v17, %v618_v18  ;;  %v584_v17 = vsel %vm583_vm2, %v2771_v31, %v2765_v6  ;;  %v598_v6 = vsel %vm596_vm3, %v2787_v43, %v2782_v1 }
 0x1bb   :  { %v687_v43 = vsel %vm685_vm8, %v2843_v44, %v2841_v15 }
 0x1bc   :  { %v639_v18 = vadd.f32 %v635_v62, %v2574_v48  ;;  %v671_v48 = vsel %vm668_vm7, %v2829_v16, %v2835_v42  ;;  %vm66_vm0 = vcmp.ge.f32.partialorder %v2917_v39, 1.0 }
 0x1bd   :  { %v2864_v0 = vpop.permute.xlu1 %1126  ;;  %v2866_v14 = vpop.permute.xlu0 %1130 }
 0x1be   :  { %3684 = vst [vmem:[#allocation8_spill] sm:$0xff] %v2866_v14 }
 0x1c1   :  { %v2875_v25 = vpop.permute.xlu1 %1132  ;;  %v2877_v59 = vpop.permute.xlu0 %1128 }
 0x1c2   :  { %3685 = vst [vmem:[#allocation9_spill] sm:$0xff] %v2877_v59 }
 0x1c5   :  { %v2881_v13 = vpop.permute.xlu1 %1142  ;;  %v2883_v58 = vpop.permute.xlu0 %1146 }
 0x1c6   :  { %3686 = vst [vmem:[#allocation10_spill] sm:$0xff] %v2883_v58  ;;  %v586_v58 = vsel %vm583_vm2, %v2763_v24, %v2779_v32  ;;  %v633_v24 = vsel %vm3676_vm5, %v2810_v61, %v2816_v12 }
 0x1c7   :  { %v602_v14 = vadd.f32 %v599_v54, %v586_v58  ;;  %v61_v58 = vsub.f32 %v45_v41, %v57_v57  ;;  %v58_v54 = vmul.f32 20.0, %v2917_v39  ;;  %v654_v57 = vsel %vm3674_vm6, %v2822_v37, %v2825_v28  ;;  %vm2971_vm6 = vmand %vm64_vm9, %vm68_vm11 }
 0x1c8   :  { %v670_v28 = vsel %vm668_vm7, %v2835_v42, %v2833_v55  ;;  %v597_v42 = vsel %vm596_vm3, %v2782_v1, %v2792_v56  ;;  %v656_v33 = vadd.f32 %v654_v57, %v639_v18  ;;  %vm73_vm9 = vmand %vm65_vm10, %vm69_vm12  ;;  %v688_v1 = vsel %vm685_vm8, %v2837_v4, %v2843_v44 }
 0x1c9   :  { %v2904_v2 = vpop.permute.xlu1 %1148  ;;  %v2906_v3 = vpop.permute.xlu0 %1144  ;;  %v619_v9 = vadd.f32 %v616_v22, %v602_v14  ;;  %vm77_vm14 = vcmp.ge.f32.partialorder %v61_v58, 1.0  ;;  %v2953_v41 = vsub.f32 %v46_v11, %v58_v54  ;;  %vm70_vm11 = vcmp.le.f32.partialorder %v2917_v39, 18.0  ;;  %vm80_vm10 = vmand %vm2971_vm6, %vm76_vm13 }
 0x1ca   :  { %3687 = vst [vmem:[#allocation11_spill] sm:$0xff] %v2906_v3  ;;  %v2919_v3 = vfloor.f32 %v51_v52  ;;  %v615_v56 = vsel %vm3677_vm4, %v2802_v45, %v2800_v29  ;;  %v604_v44 = vadd.f32 %v597_v42, %v584_v17  ;;  %vm81_vm12 = vmand %vm73_vm9, %vm77_vm14  ;;  %v704_v45 = vsel %vm3675_vm15, %v2851_v7, %v2849_v5 }
 0x1cb   :  { %v636_v52 = vadd.f32 %v633_v24, %v619_v9  ;;  %v585_v9 = vsel %vm583_vm2, %v2779_v32, %v2771_v31  ;;  %v614_v31 = vsel %vm3677_vm4, %v2800_v29, %v2806_v53  ;;  %v673_v32 = vadd.f32 %v671_v48, %v656_v33  ;;  %vm88_vm6 = vmand %vm80_vm10, %vm84_vm1 }
 0x1cc   :  { %v59_v27 = vmul.f32 20.0, %v2919_v3  ;;  %v603_v62 = vadd.f32 %v598_v6, %v585_v9  ;;  %v705_v29 = vsel %vm3675_vm15, %v2845_v46, %v2851_v7  ;;  %v631_v54 = vsel %vm3676_vm5, %v2812_v36, %v2818_v8  ;;  %vm74_vm1 = vmand %vm66_vm0, %vm70_vm11 }
 0x1cd   :  { %v2929_v63 = vpop.permute.xlu1 %1158  ;;  %v2931_v59 = vpop.permute.xlu0 %1160  ;;  %v640_v30 = vadd.f32 %v636_v52, %v2581_v19  ;;  %v690_v57 = vadd.f32 %v688_v1, %v673_v32  ;;  %vm67_vm13 = vcmp.ge.f32.partialorder %v2919_v3, 1.0  ;;  %vm71_vm14 = vcmp.le.f32.partialorder %v2919_v3, 18.0 }
 0x1ce   :  { %v2955_v22 = vsub.f32 %v47_v23, %v59_v27  ;;  %v632_v27 = vsel %vm3676_vm5, %v2816_v12, %v2812_v36  ;;  %v620_v18 = vadd.f32 %v615_v56, %v603_v62  ;;  %vm3690_vm9 = vcmp.le.f32.partialorder %v61_v58, 18.0  ;;  %vm3052_vm5 = vmand %vm67_vm13, %vm71_vm14 }
 0x1cf   :  { %v657_v24 = vadd.f32 %v653_v34, %v640_v30  ;;  %v621_v30 = vadd.f32 %v614_v31, %v604_v44  ;;  %vm3039_vm15 = vmand %vm81_vm12, %vm3690_vm9  ;;  %v707_v8 = vadd.f32 %v705_v29, %v690_v57  ;;  %vm78_vm10 = vcmp.ge.f32.partialorder %v2953_v41, 1.0 }
 0x1d0   :  { %v637_v48 = vadd.f32 %v632_v27, %v620_v18  ;;  %vm79_vm12 = vcmp.ge.f32.partialorder %v2955_v22, 1.0  ;;  %v3057_v58 = vsel %vm88_vm6, 1.0, %v2257_v35  ;;  %vm86_vm9 = vcmp.le.f32.partialorder %v2953_v41, 18.0  ;;  %vm82_vm11 = vmand %vm74_vm1, %vm78_vm10 }
 0x1d1   :  { %v2938_v61 = vpop.permute.xlu1 %1162  ;;  %v2940_v14 = vpop.permute.xlu0 %1180  ;;  %v674_v26 = vadd.f32 %v670_v28, %v657_v24  ;;  %v638_v28 = vadd.f32 %v631_v54, %v621_v30  ;;  %vm3695_vm4 = vcmp.lt.s32.totalorder %v2857_v20, 127  ;;  %v716_v6 = vadd.f32 %v2755_v50, %v707_v8  ;;  %v3699_v54 = vld [vmem:[#allocation9_spill] sm:$0xff]  ;;  %v3701_v8 = vld [vmem:[#allocation6_spill] sm:$0xff] }
 0x1d2   :  { %v652_v19 = vsel %vm3695_vm4, %v2827_v21, %v2831_v40  ;;  %vm3696_vm0 = vmmov %vm3695_vm4  ;;  %v641_v33 = vadd.f32 %v637_v48, %v2576_v49  ;;  %v3074_v9 = vsel %vm3039_vm15, 1.0, %v2257_v35  ;;  %vm87_vm6 = vcmp.le.f32.partialorder %v2955_v22, 18.0  ;;  %v3703_v48 = vld [vmem:[#allocation11_spill] sm:$0xff] }
 0x1d3   :  { %v691_v34 = vadd.f32 %v687_v43, %v674_v26  ;;  %v655_v39 = vsel %vm3696_vm0, %v2831_v40, %v2822_v37  ;;  %v642_v24 = vadd.f32 %v638_v28, %v2584_v51  ;;  %vm83_vm4 = vmand %vm3052_vm5, %vm79_vm12  ;;  %v669_v49 = vsel %vm668_vm7, %v2833_v55, %v2839_v47 }
 0x1d4   :  { %v1137_v51 = vsel %vm596_vm3, %v2875_v25, %v2864_v0  ;;  %v658_v37 = vadd.f32 %v652_v19, %v641_v33  ;;  %v672_v1 = vsel %vm668_vm7, %v2839_v47, %v2829_v16  ;;  %v686_v22 = vsel %vm685_vm8, %v2841_v15, %v2847_v38  ;;  %vm90_vm5 = vmand %vm82_vm11, %vm86_vm9 }
 0x1d5   :  { %v2975_v11 = vpop.permute.xlu1 %1164  ;;  %v2977_v23 = vpop.permute.xlu0 %1184  ;;  %v708_v17 = vadd.f32 %v704_v45, %v691_v34  ;;  %v659_v40 = vadd.f32 %v655_v39, %v642_v24  ;;  %v3102_v55 = vmul.f32 %v716_v6, %v3057_v58  ;;  %v1125_v31 = vsel %vm583_vm2, %v2861_v10, %v2855_v60  ;;  %vm91_vm13 = vmand %vm83_vm4, %vm87_vm6  ;;  %v3700_v34 = vld [vmem:[#allocation7_spill] sm:$0xff] }
 0x1d6   :  { %vm3697_vm15 = vcmp.lt.s32.totalorder %v2857_v20, 19  ;;  %v675_v47 = vadd.f32 %v669_v49, %v658_v37  ;;  %v689_v15 = vsel %vm685_vm8, %v2847_v38, %v2837_v4  ;;  %v1138_v41 = vadd.f32 %v1137_v51, %v1125_v31 }
 0x1d7   :  { %v717_v42 = vadd.f32 %v2755_v50, %v708_v17  ;;  %v1153_v16 = vsel %vm3697_vm15, %v2904_v2, %v2881_v13  ;;  %v676_v62 = vadd.f32 %v672_v1, %v659_v40  ;;  %vm3698_vm14 = vcmp.lt.s32.totalorder %v2857_v20, 1  ;;  %v3702_v17 = vld [vmem:[#allocation8_spill] sm:$0xff]  ;;  %vm3704_vm1 = vmmov %vm3697_vm15 }
 0x1d8   :  { %v1169_v44 = vsel %vm3698_vm14, %v2975_v11, %v2929_v63  ;;  %v3127_v45 = vsel %vm90_vm5, 1.0, %v2257_v35  ;;  %v692_v29 = vadd.f32 %v686_v22, %v675_v47  ;;  %v1136_v27 = vsel %vm596_vm3, %v2864_v0, %v3699_v54  ;;  %vm3708_vm9 = vmmov %vm3704_vm1 }
 0x1d9   :  { %v3023_v53 = vpop.permute.xlu1 %1178  ;;  %v3025_v52 = vpop.permute.xlu0 %1196  ;;  %v3105_v56 = vmul.f32 %v717_v42, %v3074_v9  ;;  %v1154_v4 = vadd.f32 %v1153_v16, %v1138_v41  ;;  %v3133_v38 = vsel %vm91_vm13, 1.0, %v2257_v35  ;;  %v693_v57 = vadd.f32 %v689_v15, %v676_v62  ;;  %v3707_v42 = vld [vmem:[#allocation10_spill] sm:$0xff]  ;;  %vm3709_vm0 = vmmov %vm3698_vm14 }
 0x1da   :  { %v1124_v18 = vsel %vm583_vm2, %v2855_v60, %v3700_v34  ;;  %v730_v30 = vmul.f32 %v3102_v55, %v3102_v55  ;;  %v1122_v0 = vsel %vm583_vm2, %v3701_v8, %v2861_v10  ;;  %v1134_v28 = vsel %vm596_vm3, %v3702_v17, %v2875_v25  ;;  %vm3710_vm11 = vmmov %vm3704_vm1 }
 0x1db   :  { %v731_v7 = vmul.f32 %v3105_v56, %v3105_v56  ;;  %v1152_v60 = vsel %vm3704_vm1, %v2881_v13, %v3703_v48  ;;  %v1170_v3 = vadd.f32 %v1169_v44, %v1154_v4  ;;  %v1135_v39 = vsel %vm596_vm3, %v3699_v54, %v3702_v17  ;;  %vm3711_vm4 = vmmov %vm3709_vm0 }
 0x1dc   :  { %v1139_v6 = vadd.f32 %v1136_v27, %v1124_v18  ;;  %vm3705_vm10 = vcmp.lt.s32.totalorder %v2857_v20, 107  ;;  %v1150_v13 = vsel %vm3708_vm9, %v3707_v42, %v2904_v2  ;;  %v1168_v33 = vsel %vm3709_vm0, %v2929_v63, %v2931_v59  ;;  %v3712_v63 = vld [vmem:[#allocation2_spill] sm:$0xff]  ;;  %vm3714_vm5 = vmmov %vm3709_vm0 }
 0x1dd   :  { %v3043_v36 = vpop.permute.xlu1 %1182  ;;  %v3045_v12 = vpop.permute.xlu0 %1212  ;;  %vm3706_vm12 = vmmov %vm3705_vm10  ;;  %v1141_v51 = vadd.f32 %v1134_v28, %v1122_v0  ;;  %v1166_v2 = vsel %vm3711_vm4, %v2938_v61, %v2975_v11  ;;  %v1174_v40 = vadd.f32 %v1170_v3, %v3712_v63  ;;  %vm3713_vm6 = vcmp.lt.s32.totalorder %v2857_v20, 127 }
 0x1de   :  { %v1155_v37 = vadd.f32 %v1152_v60, %v1139_v6  ;;  %v1188_v41 = vsel %vm3713_vm6, %v3023_v53, %v2940_v14  ;;  %v724_v11 = vadd.f32 %v3105_v56, %v3102_v55  ;;  %v734_v44 = vadd.f32 %v731_v7, %v730_v30  ;;  %v3715_v7 = vld [vmem:[#allocation4_spill] sm:$0xff]  ;;  %vm3716_vm15 = vmmov %vm3713_vm6 }
 0x1df   :  { %v1157_v47 = vadd.f32 %v1150_v13, %v1141_v51  ;;  %v1167_v54 = vsel %vm3714_vm5, %v2931_v59, %v2938_v61  ;;  %v1187_v59 = vsel %vm3716_vm15, %v2940_v14, %v3043_v36  ;;  %vm3718_vm13 = vmmov %vm3713_vm6  ;;  %vm3725_vm0 = vcmask 1043456  }
 0x1e0   :  { %v1171_v15 = vadd.f32 %v1168_v33, %v1155_v37  ;;  %vm3719_vm14 = vmmov %vm3713_vm6 }
 0x1e1   :  { %v3076_v43 = vpop.permute.xlu1 %1194  ;;  %v3078_v21 = vpop.permute.xlu0 %1216  ;;  %v1173_v27 = vadd.f32 %v1166_v2, %v1157_v47  ;;  %v1186_v13 = vsel %vm3719_vm14, %v3043_v36, %v2977_v23  ;;  %vm3720_vm1 = vmmov %vm3705_vm10 }
 0x1e2   :  { %v1204_v4 = vsel %vm668_vm7, %v3076_v43, %v3025_v52  ;;  %v1175_v0 = vadd.f32 %v1171_v15, %v3715_v7  ;;  %vm3724_vm9 = vmmov %vm3720_vm1 }
 0x1e3   :  { %vm3727_vm4 = vmmov %vm3725_vm0 }
 0x1e4   :  { %v1191_v6 = vadd.f32 %v1187_v59, %v1175_v0  ;;  %vm3728_vm6 = vmmov %vm3725_vm0 }
 0x1e5   :  { %v3119_v32 = vpop.permute.xlu1 %1198  ;;  %v3121_v26 = vpop.permute.xlu0 %1228  ;;  %vm3729_vm5 = vmmov %vm3725_vm0 }
 0x1e6   :  { %v1203_v3 = vsel %vm668_vm7, %v3025_v52, %v3119_v32  ;;  %vm3730_vm15 = vmmov %vm3725_vm0 }
 0x1e9   :  { %v1201_v35 = vpop.permute.xlu1 %1200  ;;  %v701_v19 = vpop.permute.xlu0 %700 }
 0x1ea   :  { %v703_v10 = vsel %vm3705_vm10, %v2849_v5, %v701_v19  ;;  %v706_v25 = vsel %vm3706_vm12, %v701_v19, %v2845_v46  ;;  %v1123_v5 = vsel %vm583_vm2, %v3700_v34, %v3701_v8  ;;  %v1151_v46 = vsel %vm3710_vm11, %v3703_v48, %v3707_v42  ;;  %v3717_v19 = vld [vmem:[#allocation5_spill] sm:$0xff]  ;;  %vm3722_vm10 = vmmov %vm3720_vm1 }
 0x1eb   :  { %v709_v24 = vadd.f32 %v703_v10, %v692_v29  ;;  %v710_v49 = vadd.f32 %v706_v25, %v693_v57  ;;  %v1140_v16 = vadd.f32 %v1135_v39, %v1123_v5  ;;  %v1190_v57 = vadd.f32 %v1188_v41, %v1174_v40  ;;  %vm3723_vm12 = vmmov %vm3720_vm1 }
 0x1ec   :  { %v1177_v39 = vadd.f32 %v1173_v27, %v3717_v19  ;;  %v1189_v42 = vsel %vm3718_vm13, %v2977_v23, %v3023_v53  ;;  %v1207_v5 = vadd.f32 %v1203_v3, %v1191_v6  ;;  %v1202_v53 = vsel %vm668_vm7, %v3119_v32, %v1201_v35  ;;  %vm3726_vm11 = vmmov %vm3725_vm0 }
 0x1ed   :  { %v718_v1 = vadd.f32 %v2755_v50, %v709_v24  ;;  %v719_v22 = vadd.f32 %v2755_v50, %v710_v49  ;;  %v1211_v31 = vpop.permute.xlu1 %1210  ;;  %v1156_v29 = vadd.f32 %v1151_v46, %v1140_v16  ;;  %v1206_v28 = vadd.f32 %v1204_v4, %v1190_v57  ;;  %v3721_v24 = vld [vmem:[#allocation3_spill] sm:$0xff] }
 0x1ee   :  { %v1220_v61 = vsel %vm685_vm8, %v1211_v31, %v3045_v12  ;;  %v1205_v23 = vsel %vm668_vm7, %v1201_v35, %v3076_v43  ;;  %v1193_v36 = vadd.f32 %v1189_v42, %v1177_v39  ;;  %v1221_v63 = vsel %vm685_vm8, %v3078_v21, %v1211_v31 }
 0x1ef   :  { %v3193_v62 = vmul.f32 %v718_v1, %v3127_v45  ;;  %v3206_v18 = vmul.f32 %v719_v22, %v3133_v38  ;;  %v1172_v17 = vadd.f32 %v1167_v54, %v1156_v29  ;;  %v1222_v10 = vadd.f32 %v1220_v61, %v1206_v28 }
 0x1f0   :  { %v1209_v22 = vadd.f32 %v1205_v23, %v1193_v36  ;;  %vm3731_vm13 = vcmask 64512  }
 0x1f1   :  { %v1215_v34 = vpop.permute.xlu1 %1214  ;;  %v725_v8 = vadd.f32 %v724_v11, %v3193_v62  ;;  %v732_v30 = vmul.f32 %v3193_v62, %v3193_v62  ;;  %v733_v14 = vmul.f32 %v3206_v18, %v3206_v18  ;;  %v1176_v49 = vadd.f32 %v1172_v17, %v3721_v24  ;;  %vm3732_vm14 = vmmov %vm3731_vm13 }
 0x1f2   :  { %v1219_v52 = vsel %vm685_vm8, %v3045_v12, %v1215_v34  ;;  %v1218_v40 = vsel %vm685_vm8, %v1215_v34, %v3078_v21  ;;  %v1225_v16 = vadd.f32 %v1221_v63, %v1209_v22 }
 0x1f3   :  { %v726_v48 = vadd.f32 %v725_v8, %v3206_v18  ;;  %v735_v60 = vadd.f32 %v734_v44, %v732_v30  ;;  %v1192_v37 = vadd.f32 %v1186_v13, %v1176_v49  ;;  %v1223_v12 = vadd.f32 %v1219_v52, %v1207_v5  ;;  %v1275_v5 = vld [vmem:[%s3658_s8] sm:$0xff] }
 0x1f5   :  { %v1227_v25 = vpop.permute.xlu1 %1226  ;;  %727 = vadd.xlane.f32.xlu0 %v726_v48  ;;  %v736_v46 = vadd.f32 %v735_v60, %v733_v14  ;;  %v1208_v1 = vadd.f32 %v1202_v53, %v1192_v37  ;;  %v124_v53 = vld [vmem:[%s3659_s6] sm:$0xff] }
 0x1f6   :  { %v1236_v33 = vsel %vm3720_vm1, %v1227_v25, %v3121_v26  ;;  %vm3733_vm1 = vmmov %vm3725_vm0 }
 0x1f7   :  { %v1238_v51 = vadd.f32 %v1236_v33, %v1222_v10  ;;  %v1224_v47 = vadd.f32 %v1218_v40, %v1208_v1  ;;  %v1271_v33 = vld [vmem:[%s3657_s7] sm:$0xff] }
 0x1f9   :  { %v1231_v2 = vpop.permute.xlu1 %1230  ;;  %737 = vadd.xlane.f32.xlu0 %v736_v46  ;;  %v1242_v43 = vadd.f32 %v1238_v51, %v2755_v50 }
 0x1fa   :  { %v1235_v32 = vsel %vm3722_vm10, %v3121_v26, %v1231_v2  ;;  %vm3734_vm10 = vmmov %vm3725_vm0 }
 0x1fb   :  { %v1239_v35 = vadd.f32 %v1235_v32, %v1223_v12  ;;  %v1246_v11 = vmul.f32 %v1242_v43, %v3057_v58 }
 0x1fd   :  { %v1243_v15 = vadd.f32 %v1239_v35, %v2755_v50  ;;  %v1233_v41 = vpop.permute.xlu1 %1232  ;;  %v1256_v30 = vmul.f32 %v1246_v11, %v1246_v11 }
 0x1fe   :  { %v1234_v31 = vsel %vm3723_vm12, %v1231_v2, %v1233_v41  ;;  %v1237_v21 = vsel %vm3724_vm9, %v1233_v41, %v1227_v25  ;;  %vm3736_vm12 = vmmov %vm3731_vm13 }
 0x1ff   :  { %v1247_v26 = vmul.f32 %v1243_v15, %v3074_v9  ;;  %v1240_v44 = vadd.f32 %v1234_v31, %v1224_v47  ;;  %v1241_v29 = vadd.f32 %v1237_v21, %v1225_v16  ;;  %vm3737_vm9 = vmmov %vm3736_vm12 }
 0x201   :  { %v1244_v54 = vadd.f32 %v1240_v44, %v2755_v50  ;;  %v1245_v27 = vadd.f32 %v1241_v29, %v2755_v50  ;;  %v1257_v4 = vmul.f32 %v1247_v26, %v1247_v26  ;;  %v1250_v8 = vadd.f32 %v1247_v26, %v1246_v11 }
 0x203   :  { %v1248_v57 = vmul.f32 %v1244_v54, %v3127_v45  ;;  %v1249_v34 = vmul.f32 %v1245_v27, %v3133_v38  ;;  %v1260_v59 = vadd.f32 %v1257_v4, %v1256_v30 }
 0x205   :  { %v1251_v7 = vadd.f32 %v1250_v8, %v1248_v57  ;;  %v1258_v0 = vmul.f32 %v1248_v57, %v1248_v57  ;;  %v1259_v17 = vmul.f32 %v1249_v34, %v1249_v34 }
 0x207   :  { %v1252_v61 = vadd.f32 %v1251_v7, %v1249_v34  ;;  %v1261_v28 = vadd.f32 %v1260_v59, %v1258_v0 }
 0x209   :  { %1253 = vadd.xlane.f32.xlu1 %v1252_v61  ;;  %v1262_v48 = vadd.f32 %v1261_v28, %v1259_v17 }
 0x20b   :  { %1263 = vadd.xlane.f32.xlu0 %v1262_v48 }
 0x27e   :  { %v728_v60 = vpop.xlane.xlu0 %727 }
 0x282   :  { %v738_v3 = vpop.xlane.xlu0 %737 }
 0x292   :  { %v1254_v19 = vpop.xlane.xlu1 %1253 }
 0x293   :  { %v1255_v50 = vadd.f32 %v1254_v19, %v728_v60  ;;  %v2239_v19 = vld [vmem:[%s3660_s4] sm:$0xff]  }
 0x294   :  { %v1264_v39 = vpop.xlane.xlu0 %1263 }
 0x295   :  { %v1266_v6 = vmul.f32 0.0015432099, %v1255_v50  ;;  %v1265_v10 = vadd.f32 %v1264_v39, %v738_v3 }
 0x297   :  { %v1268_v25 = vmul.f32 %v1266_v6, %v1266_v6  ;;  %v1267_v14 = vmul.f32 0.0015432099, %v1265_v10 }
 0x299   :  { %v1269_v42 = vsub.f32 %v1267_v14, %v1268_v25  ;;  %v3735_v25 = vmov 0   ;;  %v2240_v14 = vld [vmem:[%s3660_s4 + $0x8] sm:$0xff]  }
 0x29b   :  { %v1270_v13 = vmax.f32 %v1269_v42, 0.0  ;;  %v2241_v42 = vld [vmem:[%s3660_s4 + $0x10] sm:$0xff]  }
 0x29d   :  { %v1272_v52 = vadd.f32 1e-05, %v1270_v13  ;;  %v2242_v13 = vld [vmem:[%s3660_s4 + $0x18] sm:$0xff]  }
 0x29f   :  { %2244 = vrsqrt.f32 %v1272_v52  ;;  %v2243_v52 = vld [vmem:[%s3660_s4 + $0x20] ss:$0 sps:$4 sm:$0xff]  }
 0x2ac   :  { %v2245_v24 = vpop.eup %2244 }
 0x2ad   :  { %v1274_v49 = vmul.f32 %v2245_v24, %v1271_v33 }
 0x2af   :  { %1280 = vperm.xlu1 %2212, %v1274_v49   ;;  %v1276_v51 = vmul.f32 %v1274_v49, %v1266_v6 }
 0x2b1   :  { %v1277_v46 = vsub.f32 %v1275_v5, %v1276_v51 }
 0x2b3   :  { %1289 = vperm.xlu0 %2211, %v1277_v46  }
 0x2b7   :  { %1650 = vperm.xlu0 %2211, %v124_v53  }
 0x32a   :  { %v1281_v23 = vpop.permute.xlu1 %1280 }
 0x32b   :  { %v1284_v36 = vmul.f32 %v1281_v23, %v3105_v56  ;;  %v1286_v37 = vmul.f32 %v1281_v23, %v3206_v18  ;;  %v1283_v12 = vmul.f32 %v1281_v23, %v3102_v55  ;;  %v1285_v2 = vmul.f32 %v1281_v23, %v3193_v62 }
 0x32c   :  { %v1678_v40 = vmul.f32 %v1281_v23, %v1247_v26  ;;  %v1680_v32 = vmul.f32 %v1281_v23, %v1249_v34  ;;  %v1677_v1 = vmul.f32 %v1281_v23, %v1246_v11  ;;  %v1679_v22 = vmul.f32 %v1281_v23, %v1248_v57 }
 0x32e   :  { %v1290_v63 = vpop.permute.xlu0 %1289 }
 0x32f   :  { %v1293_v43 = vadd.f32 %v1290_v63, %v1284_v36  ;;  %v1295_v35 = vadd.f32 %v1290_v63, %v1286_v37  ;;  %v1292_v16 = vadd.f32 %v1290_v63, %v1283_v12  ;;  %v1294_v47 = vadd.f32 %v1290_v63, %v1285_v2 }
 0x330   :  { %v1682_v15 = vadd.f32 %v1678_v40, %v1290_v63  ;;  %v1684_v41 = vadd.f32 %v1680_v32, %v1290_v63  ;;  %v1681_v31 = vadd.f32 %v1677_v1, %v1290_v63  ;;  %v1683_v21 = vadd.f32 %v1679_v22, %v1290_v63 }
 0x331   :  { %v1297_v56 = vmax.f32 %v1293_v43, 0.0  ;;  %v1299_v44 = vmax.f32 %v1295_v35, 0.0  ;;  %v1296_v18 = vmax.f32 %v1292_v16, 0.0  ;;  %v1298_v29 = vmax.f32 %v1294_v47, 0.0 }
 0x332   :  { %v1686_v55 = vmax.f32 %v1682_v15, 0.0  ;;  %v1688_v54 = vmax.f32 %v1684_v41, 0.0  ;;  %v1685_v62 = vmax.f32 %v1681_v31, 0.0  ;;  %v1687_v27 = vmax.f32 %v1683_v21, 0.0 }
 0x333   :  { %v1301_v26 = vmul.f32 %v1297_v56, %v3074_v9  ;;  %v1303_v11 = vmul.f32 %v1299_v44, %v3133_v38  ;;  %v1300_v4 = vmul.f32 %v1296_v18, %v3057_v58  ;;  %v1302_v57 = vmul.f32 %v1298_v29, %v3127_v45 }
 0x334   :  { %v1690_v34 = vmul.f32 %v1686_v55, %v3074_v9  ;;  %v1692_v8 = vmul.f32 %v1688_v54, %v3133_v38  ;;  %v1689_v30 = vmul.f32 %v1685_v62, %v3057_v58  ;;  %v1691_v7 = vmul.f32 %v1687_v27, %v3127_v45 }
 0x335   :  { %v1305_v0 = vpack.c.bf16 %v1301_v26, %v1301_v26  ;;  %v1307_v59 = vpack.c.bf16 %v1303_v11, %v1303_v11  ;;  %v1304_v61 = vpack.c.bf16 %v1300_v4, %v1300_v4  ;;  %v1306_v17 = vpack.c.bf16 %v1302_v57, %v1302_v57 }
 0x336   :  { %v1694_v28 = vpack.c.bf16 %v1690_v34, %v1690_v34  ;;  %v1696_v48 = vpack.c.bf16 %v1692_v8, %v1692_v8  ;;  %v1693_v50 = vpack.c.bf16 %v1689_v30, %v1689_v30  ;;  %v1695_v39 = vpack.c.bf16 %v1691_v7, %v1691_v7 }
 0x337   :  { %2173 = vmatprep.subr.msk.bf16.mxu0 %vm3725_vm0, %v1305_v0  ;;  %2179 = vmatprep.subr.msk.bf16.mxu1 %vm3726_vm11, %v1307_v59  ;;  %v1347_v60 = vsel %vm3727_vm4, %v1304_v61, 0  ;;  %v1353_v3 = vsel %vm3728_vm6, %v1306_v17, 0  ;;  %vm3738_vm0 = vmmov %vm3737_vm9 }
 0x338   :  { %1373 = vmatpush1.bf16.msra.mxu0 %v1347_v60  ;;  %1454 = vmatpush1.bf16.msra.mxu1 %v1353_v3  ;;  %v1698_v6 = vsel %vm3733_vm1, %v1693_v50, 0  ;;  %v1704_v10 = vsel %vm3734_vm10, %v1695_v39, 0  ;;  %vm3739_vm11 = vmmov %vm3738_vm0 }
 0x339   :  { %2185 = vmatprep.subr.msk.bf16.mxu0 %vm3729_vm5, %v1694_v28  ;;  %2191 = vmatprep.subr.msk.bf16.mxu1 %vm3730_vm15, %v1696_v48  ;;  %vm3740_vm4 = vmmov %vm3738_vm0 }
 0x33a   :  { %vm3741_vm6 = vmmov %vm3738_vm0 }
 0x33b   :  { %2174 = vmatmul.mubr.msk.bf16.vlgmr.msra.gmra.mxu0 %vm3731_vm13, %v2239_v19  ;;  %2180 = vmatmul.mubr.msk.bf16.vlgmr.msra.gmra.mxu1 %vm3732_vm14, %v2239_v19  ;;  %vm3742_vm5 = vmmov %vm3738_vm0 }
 0x33c   :  { %1724 = vmatpush1.bf16.msra.mxu0 %v1698_v6  ;;  %1805 = vmatpush1.bf16.msra.mxu1 %v1704_v10  ;;  %vm3743_vm15 = vmmov %vm3738_vm0 }
 0x33d   :  { %1400 = vmatprep.mubr.bf16.mxu0 %v3735_v25  ;;  %1481 = vmatprep.mubr.bf16.mxu1 %v3735_v25  ;;  %vm3744_vm13 = vmmov %vm3738_vm0 }
 0x33e   :  { %vm3745_vm14 = vmmov %vm3738_vm0 }
 0x33f   :  { %vm3746_vm1 = vmmov %vm3738_vm0 }
 0x340   :  { %vm3747_vm10 = vmmov %vm3738_vm0 }
 0x343   :  { %2175 = vmatmul.mubr.msk.bf16.gmra.mxu0 %vm3736_vm12, %v2240_v14  ;;  %2181 = vmatmul.mubr.msk.bf16.gmra.mxu1 %vm3737_vm9, %v2240_v14  ;;  %vm3748_vm12 = vmmov %vm3738_vm0 }
 0x344   :  { %1410 = vmatprep.mubr.bf16.mxu0 %v3735_v25  ;;  %1491 = vmatprep.mubr.bf16.mxu1 %v3735_v25  ;;  %vm3749_vm9 = vmmov %vm3738_vm0 }
 0x34b   :  { %2176 = vmatmul.mubr.msk.bf16.gmra.mxu0 %vm3738_vm0, %v2241_v42  ;;  %2182 = vmatmul.mubr.msk.bf16.gmra.mxu1 %vm3739_vm11, %v2241_v42  ;;  %vm3750_vm11 = vmmov %vm3738_vm0 }
 0x34c   :  { %1420 = vmatprep.mubr.bf16.mxu0 %v3735_v25  ;;  %1501 = vmatprep.mubr.bf16.mxu1 %v3735_v25 }
 0x353   :  { %2177 = vmatmul.mubr.msk.bf16.gmra.mxu0 %vm3740_vm4, %v2242_v13  ;;  %2183 = vmatmul.mubr.msk.bf16.gmra.mxu1 %vm3741_vm6, %v2242_v13  ;;  %vm3751_vm4 = vmmov %vm3738_vm0 }
 0x354   :  { %1511 = vmatprep.mubr.bf16.mxu1 %v3735_v25  ;;  %1430 = vmatprep.mubr.bf16.mxu0 %v3735_v25  ;;  %vm3752_vm6 = vmmov %vm3738_vm0 }
 0x35b   :  { %2184 = vmatmul.mubr.msk.bf16.gmra.mxu1 %vm3742_vm5, %v2243_v52  ;;  %2178 = vmatmul.mubr.msk.bf16.gmra.mxu0 %vm3743_vm15, %v2243_v52  ;;  %vm3753_vm5 = vcmp.lt.s32.totalorder %v2857_v20, 19 }
 0x35c   :  { %1822 = vmatprep.mubr.bf16.mxu1 %v3735_v25  ;;  %1741 = vmatprep.mubr.bf16.mxu0 %v3735_v25  ;;  %vm3754_vm15 = vmmov %vm3753_vm5 }
 0x363   :  { %2192 = vmatmul.mubr.msk.bf16.vlgmr.msra.gmra.mxu1 %vm3744_vm13, %v2239_v19  ;;  %2186 = vmatmul.mubr.msk.bf16.vlgmr.msra.gmra.mxu0 %vm3745_vm14, %v2239_v19  ;;  %vm3755_vm13 = vmmov %vm3753_vm5 }
 0x364   :  { %1751 = vmatprep.mubr.bf16.mxu0 %v3735_v25  ;;  %1832 = vmatprep.mubr.bf16.mxu1 %v3735_v25  ;;  %vm3756_vm14 = vmmov %vm3753_vm5 }
 0x36b   :  { %2187 = vmatmul.mubr.msk.bf16.gmra.mxu0 %vm3746_vm1, %v2240_v14  ;;  %2193 = vmatmul.mubr.msk.bf16.gmra.mxu1 %vm3747_vm10, %v2240_v14  ;;  %vm3757_vm1 = vcmp.lt.s32.totalorder %v2857_v20, 1 }
 0x36c   :  { %1761 = vmatprep.mubr.bf16.mxu0 %v3735_v25  ;;  %1842 = vmatprep.mubr.bf16.mxu1 %v3735_v25  ;;  %vm3758_vm10 = vmmov %vm3757_vm1 }
 0x373   :  { %2188 = vmatmul.mubr.msk.bf16.gmra.mxu0 %vm3748_vm12, %v2241_v42  ;;  %2194 = vmatmul.mubr.msk.bf16.gmra.mxu1 %vm3749_vm9, %v2241_v42  ;;  %vm3759_vm12 = vmmov %vm3757_vm1 }
 0x374   :  { %1771 = vmatprep.mubr.bf16.mxu0 %v3735_v25  ;;  %1852 = vmatprep.mubr.bf16.mxu1 %v3735_v25  ;;  %vm3760_vm9 = vmmov %vm3757_vm1 }
 0x37b   :  { %2189 = vmatmul.mubr.msk.bf16.gmra.mxu0 %vm3738_vm0, %v2242_v13  ;;  %2195 = vmatmul.mubr.msk.bf16.gmra.mxu1 %vm3750_vm11, %v2242_v13  ;;  %vm3761_vm0 = vcmp.lt.s32.totalorder %v2857_v20, 127 }
 0x37c   :  { %1781 = vmatprep.mubr.bf16.mxu0 %v3735_v25  ;;  %1862 = vmatprep.mubr.bf16.mxu1 %v3735_v25  ;;  %vm3762_vm11 = vmmov %vm3761_vm0 }
 0x383   :  { %2190 = vmatmul.mubr.msk.bf16.gmra.mxu0 %vm3751_vm4, %v2243_v52  ;;  %2196 = vmatmul.mubr.msk.bf16.gmra.mxu1 %vm3752_vm6, %v2243_v52  ;;  %vm3763_vm4 = vmmov %vm3761_vm0 }
 0x384   :  { %vm3764_vm6 = vmmov %vm3761_vm0 }
 0x3fb   :  { %v1392_v33 = vpop.f32.mrf.mxu0  ;;  %v1473_v24 = vpop.f32.mrf.mxu1 }
 0x3fc   :  { %1524 = vrot.lane.b32.xlu0 %v1473_v24, %s2249_s5  ;;  %1520 = vrot.lane.b32.xlu1 %v1392_v33, %s2249_s5 }
 0x3fd   :  { %v1394_v49 = vpop.f32.mrf.mxu0  ;;  %v1475_v5 = vpop.f32.mrf.mxu1 }
 0x3ff   :  { %v1396_v51 = vpop.f32.mrf.mxu0  ;;  %v1477_v46 = vpop.f32.mrf.mxu1 }
 0x400   :  { %1526 = vrot.lane.b32.xlu0 %v1475_v5, %s2249_s5  ;;  %1522 = vrot.lane.b32.xlu1 %v1394_v49, %s2249_s5 }
 0x401   :  { %v1398_v53 = vpop.f32.mrf.mxu0  ;;  %v1479_v23 = vpop.f32.mrf.mxu1 }
 0x403   :  { %v1402_v36 = vpop.f32.mrf.mxu0  ;;  %v1483_v37 = vpop.f32.mrf.mxu1 }
 0x404   :  { %1532 = vrot.lane.b32.xlu1 %v1396_v51, %s2250_s13  ;;  %1534 = vrot.lane.b32.xlu0 %v1398_v53, %s2250_s13 }
 0x405   :  { %v1404_v12 = vpop.f32.mrf.mxu0  ;;  %v1485_v2 = vpop.f32.mrf.mxu1 }
 0x407   :  { %v1406_v63 = vpop.f32.mrf.mxu0  ;;  %v1487_v40 = vpop.f32.mrf.mxu1 }
 0x408   :  { %1536 = vrot.lane.b32.xlu1 %v1477_v46, %s2250_s13  ;;  %1548 = vrot.lane.b32.xlu0 %v1402_v36, %s2251_s14 }
 0x409   :  { %v1408_v32 = vpop.f32.mrf.mxu0  ;;  %v1489_v1 = vpop.f32.mrf.mxu1 }
 0x40b   :  { %v3359_v22 = vpop.f32.mrf.mxu0  ;;  %v3361_v43 = vpop.f32.mrf.mxu1 }
 0x40c   :  { %1538 = vrot.lane.b32.xlu1 %v1479_v23, %s2250_s13  ;;  %1552 = vrot.lane.b32.xlu0 %v1483_v37, %s2251_s14 }
 0x40d   :  { %v3365_v35 = vpop.f32.mrf.mxu0  ;;  %v3367_v16 = vpop.f32.mrf.mxu1 }
 0x40f   :  { %v1416_v47 = vpop.f32.mrf.mxu0  ;;  %v1497_v15 = vpop.f32.mrf.mxu1 }
 0x410   :  { %1554 = vrot.lane.b32.xlu0 %v1485_v2, %s2251_s14  ;;  %1550 = vrot.lane.b32.xlu1 %v1404_v12, %s2251_s14 }
 0x411   :  { %v1418_v41 = vpop.f32.mrf.mxu0  ;;  %v1499_v31 = vpop.f32.mrf.mxu1 }
 0x413   :  { %v1422_v21 = vpop.f32.mrf.mxu0  ;;  %v1503_v56 = vpop.f32.mrf.mxu1 }
 0x414   :  { %1568 = vrot.lane.b32.xlu0 %v1487_v40, %s2252_s15  ;;  %1564 = vrot.lane.b32.xlu1 %v1406_v63, %s2252_s15 }
 0x415   :  { %v1424_v44 = vpop.f32.mrf.mxu0  ;;  %v1505_v18 = vpop.f32.mrf.mxu1 }
 0x417   :  { %v1426_v29 = vpop.f32.mrf.mxu0  ;;  %v1507_v55 = vpop.f32.mrf.mxu1 }
 0x418   :  { %1570 = vrot.lane.b32.xlu1 %v1489_v1, %s2252_s15  ;;  %1566 = vrot.lane.b32.xlu0 %v1408_v32, %s2252_s15 }
 0x419   :  { %v1509_v54 = vpop.f32.mrf.mxu1  ;;  %v1428_v62 = vpop.f32.mrf.mxu0 }
 0x41b   :  { %v1513_v27 = vpop.f32.mrf.mxu1  ;;  %v1432_v26 = vpop.f32.mrf.mxu0 }
 0x41c   :  { %1584 = vrot.lane.b32.xlu0 %v1416_v47, %s2253_s1  ;;  %1586 = vrot.lane.b32.xlu1 %v1418_v41, %s2253_s1 }
 0x41d   :  { %v3377_v11 = vpop.f32.mrf.mxu1  ;;  %v1434_v4 = vpop.f32.mrf.mxu0 }
 0x41f   :  { %v1517_v57 = vpop.f32.mrf.mxu1  ;;  %v1436_v34 = vpop.f32.mrf.mxu0 }
 0x420   :  { %1588 = vrot.lane.b32.xlu0 %v1497_v15, %s2253_s1  ;;  %1600 = vrot.lane.b32.xlu1 %v1422_v21, %s2254_s16 }
 0x421   :  { %v1518_v8 = vpop.f32.mrf.mxu1  ;;  %v1437_v30 = vpop.f32.mrf.mxu0 }
 0x423   :  { %v1824_v7 = vpop.f32.mrf.mxu1  ;;  %v1743_v0 = vpop.f32.mrf.mxu0 }
 0x424   :  { %1590 = vrot.lane.b32.xlu0 %v1499_v31, %s2253_s1  ;;  %1604 = vrot.lane.b32.xlu1 %v1503_v56, %s2254_s16  ;;  %v3425_v56 = vpop.permute.xlu0 %1650 }
 0x425   :  { %v1745_v59 = vpop.f32.mrf.mxu0  ;;  %v1826_v61 = vpop.f32.mrf.mxu1 }
 0x427   :  { %v1747_v17 = vpop.f32.mrf.mxu0  ;;  %v1828_v28 = vpop.f32.mrf.mxu1 }
 0x428   :  { %1602 = vrot.lane.b32.xlu0 %v1424_v44, %s2254_s16  ;;  %1616 = vrot.lane.b32.xlu1 %v1426_v29, %s2255_s17 }
 0x429   :  { %v1830_v48 = vpop.f32.mrf.mxu1  ;;  %v1749_v60 = vpop.f32.mrf.mxu0 }
 0x42b   :  { %v1753_v3 = vpop.f32.mrf.mxu0  ;;  %v1834_v19 = vpop.f32.mrf.mxu1 }
 0x42c   :  { %1606 = vrot.lane.b32.xlu0 %v1505_v18, %s2254_s16  ;;  %1620 = vrot.lane.b32.xlu1 %v1507_v55, %s2255_s17 }
 0x42d   :  { %v1755_v50 = vpop.f32.mrf.mxu0  ;;  %v1836_v39 = vpop.f32.mrf.mxu1 }
 0x42f   :  { %v1757_v6 = vpop.f32.mrf.mxu0  ;;  %v1838_v10 = vpop.f32.mrf.mxu1 }
 0x430   :  { %1622 = vrot.lane.b32.xlu1 %v1509_v54, %s2255_s17  ;;  %1618 = vrot.lane.b32.xlu0 %v1428_v62, %s2255_s17 }
 0x431   :  { %v1759_v25 = vpop.f32.mrf.mxu0  ;;  %v1840_v14 = vpop.f32.mrf.mxu1 }
 0x433   :  { %v3389_v42 = vpop.f32.mrf.mxu0  ;;  %v3391_v13 = vpop.f32.mrf.mxu1 }
 0x434   :  { %1632 = vrot.lane.b32.xlu0 %v1432_v26, %s2256_s18  ;;  %1634 = vrot.lane.b32.xlu1 %v1434_v4, %s2256_s18 }
 0x435   :  { %v3395_v52 = vpop.f32.mrf.mxu0  ;;  %v3397_v33 = vpop.f32.mrf.mxu1 }
 0x437   :  { %v1767_v24 = vpop.f32.mrf.mxu0  ;;  %v1848_v49 = vpop.f32.mrf.mxu1 }
 0x438   :  { %1636 = vrot.lane.b32.xlu0 %v1513_v27, %s2256_s18  ;;  %1875 = vrot.lane.b32.xlu1 %v1824_v7, %s2249_s5 }
 0x439   :  { %v1769_v5 = vpop.f32.mrf.mxu0  ;;  %v1850_v51 = vpop.f32.mrf.mxu1 }
 0x43b   :  { %v1773_v46 = vpop.f32.mrf.mxu0  ;;  %v1854_v53 = vpop.f32.mrf.mxu1 }
 0x43c   :  { %1871 = vrot.lane.b32.xlu0 %v1743_v0, %s2249_s5  ;;  %1873 = vrot.lane.b32.xlu1 %v1745_v59, %s2249_s5 }
 0x43d   :  { %v1775_v23 = vpop.f32.mrf.mxu0  ;;  %v1856_v36 = vpop.f32.mrf.mxu1 }
 0x43f   :  { %v1777_v37 = vpop.f32.mrf.mxu0  ;;  %v1858_v12 = vpop.f32.mrf.mxu1 }
 0x440   :  { %1877 = vrot.lane.b32.xlu0 %v1826_v61, %s2249_s5  ;;  %1883 = vrot.lane.b32.xlu1 %v1747_v17, %s2250_s13 }
 0x441   :  { %v1779_v2 = vpop.f32.mrf.mxu0  ;;  %v1860_v63 = vpop.f32.mrf.mxu1 }
 0x443   :  { %v1783_v40 = vpop.f32.mrf.mxu0  ;;  %v1864_v32 = vpop.f32.mrf.mxu1 }
 0x444   :  { %1887 = vrot.lane.b32.xlu0 %v1828_v28, %s2250_s13  ;;  %1889 = vrot.lane.b32.xlu1 %v1830_v48, %s2250_s13 }
 0x445   :  { %v1866_v1 = vpop.f32.mrf.mxu1  ;;  %v1785_v47 = vpop.f32.mrf.mxu0 }
 0x447   :  { %v1787_v15 = vpop.f32.mrf.mxu0  ;;  %v1868_v41 = vpop.f32.mrf.mxu1 }
 0x448   :  { %1885 = vrot.lane.b32.xlu0 %v1749_v60, %s2250_s13  ;;  %1899 = vrot.lane.b32.xlu1 %v1753_v3, %s2251_s14 }
 0x449   :  { %v1788_v31 = vpop.f32.mrf.mxu0  ;;  %v1869_v21 = vpop.f32.mrf.mxu1 }
 0x44c   :  { %1903 = vrot.lane.b32.xlu0 %v1834_v19, %s2251_s14  ;;  %1905 = vrot.lane.b32.xlu1 %v1836_v39, %s2251_s14 }
 0x450   :  { %1901 = vrot.lane.b32.xlu0 %v1755_v50, %s2251_s14  ;;  %1915 = vrot.lane.b32.xlu1 %v1757_v6, %s2252_s15 }
 0x454   :  { %1919 = vrot.lane.b32.xlu1 %v1838_v10, %s2252_s15  ;;  %1917 = vrot.lane.b32.xlu0 %v1759_v25, %s2252_s15 }
 0x458   :  { %1921 = vrot.lane.b32.xlu1 %v1840_v14, %s2252_s15  ;;  %1937 = vrot.lane.b32.xlu0 %v1769_v5, %s2253_s1 }
 0x45c   :  { %1935 = vrot.lane.b32.xlu1 %v1767_v24, %s2253_s1  ;;  %1941 = vrot.lane.b32.xlu0 %v1850_v51, %s2253_s1 }
 0x460   :  { %1939 = vrot.lane.b32.xlu1 %v1848_v49, %s2253_s1  ;;  %1953 = vrot.lane.b32.xlu0 %v1775_v23, %s2254_s16 }
 0x464   :  { %1951 = vrot.lane.b32.xlu1 %v1773_v46, %s2254_s16  ;;  %1967 = vrot.lane.b32.xlu0 %v1777_v37, %s2255_s17 }
 0x468   :  { %1955 = vrot.lane.b32.xlu1 %v1854_v53, %s2254_s16  ;;  %1971 = vrot.lane.b32.xlu0 %v1858_v12, %s2255_s17 }
 0x46c   :  { %1957 = vrot.lane.b32.xlu1 %v1856_v36, %s2254_s16  ;;  %1983 = vrot.lane.b32.xlu0 %v1783_v40, %s2256_s18 }
 0x46e   :  { %v1521_v44 = vpop.permute.xlu1 %1520  ;;  %v1525_v18 = vpop.permute.xlu0 %1524 }
 0x470   :  { %1969 = vrot.lane.b32.xlu1 %v1779_v2, %s2255_s17  ;;  %1987 = vrot.lane.b32.xlu0 %v1864_v32, %s2256_s18 }
 0x472   :  { %v1523_v29 = vpop.permute.xlu1 %1522  ;;  %v1527_v55 = vpop.permute.xlu0 %1526 }
 0x473   :  { %v1529_v54 = vsel %vm583_vm2, %v1523_v29, %v1525_v18  ;;  %v1530_v62 = vsel %vm583_vm2, %v1521_v44, %v1523_v29  ;;  %v1528_v27 = vsel %vm583_vm2, %v1525_v18, %v1527_v55  ;;  %v1531_v26 = vsel %vm583_vm2, %v1527_v55, %v1521_v44 }
 0x474   :  { %1973 = vrot.lane.b32.xlu1 %v1860_v63, %s2255_s17  ;;  %1989 = vrot.lane.b32.xlu0 %v1866_v1, %s2256_s18 }
 0x476   :  { %v1533_v4 = vpop.permute.xlu1 %1532  ;;  %v1535_v57 = vpop.permute.xlu0 %1534 }
 0x477   :  { %v1542_v34 = vsel %vm596_vm3, %v1533_v4, %v1535_v57 }
 0x478   :  { %v1545_v8 = vadd.f32 %v1542_v34, %v1530_v62  ;;  %1985 = vrot.lane.b32.xlu1 %v1785_v47, %s2256_s18 }
 0x47a   :  { %v1537_v30 = vpop.permute.xlu1 %1536  ;;  %v1549_v7 = vpop.permute.xlu0 %1548 }
 0x47b   :  { %v1541_v0 = vsel %vm596_vm3, %v1535_v57, %v1537_v30 }
 0x47c   :  { %v1546_v59 = vadd.f32 %v1541_v0, %v1529_v54  ;;  %1638 = vrot.lane.b32.xlu1 %v3377_v11, %s2256_s18 }
 0x47e   :  { %v1539_v61 = vpop.permute.xlu1 %1538  ;;  %v1553_v17 = vpop.permute.xlu0 %1552 }
 0x47f   :  { %v1540_v28 = vsel %vm596_vm3, %v1537_v30, %v1539_v61  ;;  %v1543_v48 = vsel %vm596_vm3, %v1539_v61, %v1533_v4 }
 0x480   :  { %v1544_v60 = vadd.f32 %v1543_v48, %v1531_v26  ;;  %v1547_v3 = vadd.f32 %v1540_v28, %v1528_v27 }
 0x482   :  { %v1551_v19 = vpop.permute.xlu1 %1550  ;;  %v1555_v50 = vpop.permute.xlu0 %1554 }
 0x483   :  { %v1557_v39 = vsel %vm3753_vm5, %v1551_v19, %v1553_v17  ;;  %v1558_v6 = vsel %vm3754_vm15, %v1549_v7, %v1551_v19  ;;  %v1556_v11 = vsel %vm3755_vm13, %v1553_v17, %v1555_v50  ;;  %v1559_v10 = vsel %vm3756_vm14, %v1555_v50, %v1549_v7  ;;  %vm3767_vm14 = vmmov %vm3755_vm13 }
 0x484   :  { %v1561_v25 = vadd.f32 %v1558_v6, %v1545_v8  ;;  %v1562_v14 = vadd.f32 %v1557_v39, %v1546_v59  ;;  %v1560_v24 = vadd.f32 %v1559_v10, %v1544_v60  ;;  %v1563_v49 = vadd.f32 %v1556_v11, %v1547_v3 }
 0x485   :  { %vm3765_vm5 = vcmp.lt.s32.totalorder %v2857_v20, 107 }
 0x486   :  { %v1565_v5 = vpop.permute.xlu1 %1564  ;;  %v1569_v51 = vpop.permute.xlu0 %1568  ;;  %vm3766_vm15 = vmmov %vm3765_vm5 }
 0x48a   :  { %v1571_v46 = vpop.permute.xlu1 %1570  ;;  %v1567_v53 = vpop.permute.xlu0 %1566 }
 0x48b   :  { %v1572_v23 = vsel %vm3757_vm1, %v1569_v51, %v1571_v46  ;;  %v1575_v36 = vsel %vm3758_vm10, %v1571_v46, %v1565_v5  ;;  %v1573_v37 = vsel %vm3759_vm12, %v1567_v53, %v1569_v51  ;;  %v1574_v12 = vsel %vm3760_vm9, %v1565_v5, %v1567_v53  ;;  %vm3768_vm1 = vmmov %vm3755_vm13 }
 0x48c   :  { %v1576_v2 = vadd.f32 %v1575_v36, %v1560_v24  ;;  %v1579_v63 = vadd.f32 %v1572_v23, %v1563_v49  ;;  %v1577_v40 = vadd.f32 %v1574_v12, %v1561_v25  ;;  %v1578_v32 = vadd.f32 %v1573_v37, %v1562_v14  ;;  %vm3769_vm10 = vmmov %vm3760_vm9 }
 0x48d   :  { %vm3770_vm12 = vmmov %vm3760_vm9 }
 0x48e   :  { %v1587_v1 = vpop.permute.xlu1 %1586  ;;  %v1580_v47 = vadd.f32 %v1576_v2, %v3359_v22  ;;  %v1585_v15 = vpop.permute.xlu0 %1584  ;;  %v1581_v44 = vadd.f32 %v1577_v40, %v3365_v35  ;;  %v1582_v62 = vadd.f32 %v1578_v32, %v3361_v43  ;;  %v1583_v27 = vadd.f32 %v1579_v63, %v3367_v16  ;;  %vm3771_vm9 = vmmov %vm3768_vm1 }
 0x48f   :  { %v1594_v41 = vsel %vm3761_vm0, %v1585_v15, %v1587_v1 }
 0x490   :  { %v1596_v31 = vadd.f32 %v1594_v41, %v1580_v47 }
 0x492   :  { %v1601_v21 = vpop.permute.xlu1 %1600  ;;  %v1589_v18 = vpop.permute.xlu0 %1588 }
 0x493   :  { %v1593_v29 = vsel %vm3762_vm11, %v1587_v1, %v1589_v18 }
 0x494   :  { %v1597_v55 = vadd.f32 %v1593_v29, %v1581_v44 }
 0x496   :  { %v1605_v54 = vpop.permute.xlu1 %1604  ;;  %v1591_v26 = vpop.permute.xlu0 %1590 }
 0x497   :  { %v1592_v22 = vsel %vm3763_vm4, %v1589_v18, %v1591_v26  ;;  %v1595_v4 = vsel %vm3764_vm6, %v1591_v26, %v1585_v15 }
 0x498   :  { %v1598_v57 = vadd.f32 %v1592_v22, %v1582_v62  ;;  %v1599_v34 = vadd.f32 %v1595_v4, %v1583_v27 }
 0x49a   :  { %v1617_v35 = vpop.permute.xlu1 %1616  ;;  %v1603_v8 = vpop.permute.xlu0 %1602 }
 0x49b   :  { %v1609_v30 = vsel %vm668_vm7, %v1603_v8, %v1605_v54  ;;  %v1610_v7 = vsel %vm668_vm7, %v1601_v21, %v1603_v8 }
 0x49c   :  { %v1612_v43 = vadd.f32 %v1610_v7, %v1596_v31  ;;  %v1613_v0 = vadd.f32 %v1609_v30, %v1597_v55 }
 0x49e   :  { %v1621_v16 = vpop.permute.xlu1 %1620  ;;  %v1607_v59 = vpop.permute.xlu0 %1606 }
 0x49f   :  { %v1608_v61 = vsel %vm668_vm7, %v1605_v54, %v1607_v59  ;;  %v1611_v17 = vsel %vm668_vm7, %v1607_v59, %v1601_v21 }
 0x4a0   :  { %v1614_v28 = vadd.f32 %v1608_v61, %v1598_v57  ;;  %v1615_v48 = vadd.f32 %v1611_v17, %v1599_v34 }
 0x4a2   :  { %v1623_v60 = vpop.permute.xlu1 %1622  ;;  %v1619_v3 = vpop.permute.xlu0 %1618 }
 0x4a3   :  { %v1624_v19 = vsel %vm685_vm8, %v1621_v16, %v1623_v60  ;;  %v1627_v50 = vsel %vm685_vm8, %v1623_v60, %v1617_v35  ;;  %v1625_v39 = vsel %vm685_vm8, %v1619_v3, %v1621_v16  ;;  %v1626_v6 = vsel %vm685_vm8, %v1617_v35, %v1619_v3 }
 0x4a4   :  { %v3496_v11 = vadd.f32 %v1624_v19, %v1614_v28  ;;  %v3498_v10 = vadd.f32 %v1627_v50, %v1615_v48  ;;  %v1628_v25 = vadd.f32 %v1626_v6, %v1612_v43  ;;  %v1629_v14 = vadd.f32 %v1625_v39, %v1613_v0 }
 0x4a6   :  { %v1635_v24 = vpop.permute.xlu1 %1634  ;;  %v3500_v49 = vpop.permute.xlu0 %1632 }
 0x4a7   :  { %v1642_v5 = vsel %vm3765_vm5, %v3500_v49, %v1635_v24 }
 0x4a8   :  { %v3505_v51 = vadd.f32 %v1642_v5, %v1628_v25 }
 0x4aa   :  { %v1876_v46 = vpop.permute.xlu1 %1875  ;;  %v3507_v53 = vpop.permute.xlu0 %1636 }
 0x4ab   :  { %v1641_v23 = vsel %vm3766_vm15, %v1635_v24, %v3507_v53  ;;  %vm3780_vm15 = vmmov %vm3765_vm5 }
 0x4ac   :  { %v3512_v36 = vadd.f32 %v1641_v23, %v1629_v14 }
 0x4ae   :  { %v1874_v37 = vpop.permute.xlu1 %1873  ;;  %v1872_v12 = vpop.permute.xlu0 %1871 }
 0x4af   :  { %v1880_v7 = vsel %vm583_vm2, %v1874_v37, %v1876_v46  ;;  %v1881_v39 = vsel %vm583_vm2, %v1872_v12, %v1874_v37 }
 0x4b2   :  { %v1884_v2 = vpop.permute.xlu1 %1883  ;;  %v1878_v63 = vpop.permute.xlu0 %1877 }
 0x4b3   :  { %v1879_v35 = vsel %vm583_vm2, %v1876_v46, %v1878_v63  ;;  %v1882_v43 = vsel %vm583_vm2, %v1878_v63, %v1872_v12  ;;  %vm3774_vm2 = vmmov %vm3763_vm4 }
 0x4b4   :  { %vm3775_vm11 = vmmov %vm3774_vm2 }
 0x4b5   :  { %vm3776_vm4 = vmmov %vm3774_vm2 }
 0x4b6   :  { %v1890_v40 = vpop.permute.xlu1 %1889  ;;  %v1888_v32 = vpop.permute.xlu0 %1887  ;;  %vm3777_vm6 = vmmov %vm3774_vm2 }
 0x4b7   :  { %v1891_v22 = vsel %vm596_vm3, %v1888_v32, %v1890_v40  ;;  %v1894_v4 = vsel %vm596_vm3, %v1890_v40, %v1884_v2 }
 0x4b8   :  { %v1898_v0 = vadd.f32 %v1891_v22, %v1879_v35  ;;  %v1895_v59 = vadd.f32 %v1894_v4, %v1882_v43 }
 0x4ba   :  { %v1900_v1 = vpop.permute.xlu1 %1899  ;;  %v1886_v47 = vpop.permute.xlu0 %1885 }
 0x4bb   :  { %v1892_v8 = vsel %vm596_vm3, %v1886_v47, %v1888_v32  ;;  %v1893_v61 = vsel %vm596_vm3, %v1884_v2, %v1886_v47  ;;  %vm3772_vm3 = vmmov %vm3769_vm10 }
 0x4bc   :  { %v1897_v48 = vadd.f32 %v1892_v8, %v1880_v7  ;;  %v1896_v24 = vadd.f32 %v1893_v61, %v1881_v39  ;;  %vm3773_vm0 = vmmov %vm3772_vm3 }
 0x4be   :  { %v1906_v15 = vpop.permute.xlu1 %1905  ;;  %v1904_v41 = vpop.permute.xlu0 %1903 }
 0x4bf   :  { %v1907_v30 = vsel %vm3755_vm13, %v1904_v41, %v1906_v15  ;;  %v1910_v16 = vsel %vm3767_vm14, %v1906_v15, %v1900_v1  ;;  %vm3781_vm13 = vmmov %vm3765_vm5 }
 0x4c0   :  { %v1914_v60 = vadd.f32 %v1907_v30, %v1898_v0  ;;  %v1911_v6 = vadd.f32 %v1910_v16, %v1895_v59  ;;  %vm3782_vm14 = vmmov %vm3765_vm5 }
 0x4c2   :  { %v1916_v31 = vpop.permute.xlu1 %1915  ;;  %v1902_v21 = vpop.permute.xlu0 %1901 }
 0x4c3   :  { %v1908_v17 = vsel %vm3768_vm1, %v1902_v21, %v1904_v41  ;;  %v1909_v25 = vsel %vm3771_vm9, %v1900_v1, %v1902_v21 }
 0x4c4   :  { %v1913_v5 = vadd.f32 %v1908_v17, %v1897_v48  ;;  %v1912_v63 = vadd.f32 %v1909_v25, %v1896_v24 }
 0x4c6   :  { %v1920_v44 = vpop.permute.xlu1 %1919  ;;  %v1918_v18 = vpop.permute.xlu0 %1917 }
 0x4c7   :  { %v1924_v14 = vsel %vm3772_vm3, %v1918_v18, %v1920_v44  ;;  %v1925_v23 = vsel %vm3773_vm0, %v1916_v31, %v1918_v18 }
 0x4c8   :  { %v1929_v40 = vadd.f32 %v1924_v14, %v1913_v5  ;;  %v1928_v15 = vadd.f32 %v1925_v23, %v1912_v63 }
 0x4ca   :  { %v1922_v29 = vpop.permute.xlu1 %1921  ;;  %v1938_v55 = vpop.permute.xlu0 %1937  ;;  %v1932_v4 = vadd.f32 %v1928_v15, %v3395_v52 }
 0x4cb   :  { %v1923_v28 = vsel %vm3769_vm10, %v1920_v44, %v1922_v29  ;;  %v1926_v3 = vsel %vm3770_vm12, %v1922_v29, %v1916_v31  ;;  %v1933_v31 = vadd.f32 %v1929_v40, %v3391_v13 }
 0x4cc   :  { %v1930_v46 = vadd.f32 %v1923_v28, %v1914_v60  ;;  %v1927_v2 = vadd.f32 %v1926_v3, %v1911_v6  ;;  %v1654_v28 = vadd.f32 %v3425_v56, %v3512_v36 }
 0x4ce   :  { %v1936_v54 = vpop.permute.xlu1 %1935  ;;  %v1942_v62 = vpop.permute.xlu0 %1941  ;;  %v1934_v37 = vadd.f32 %v1930_v46, %v3397_v33  ;;  %v1931_v12 = vadd.f32 %v1927_v2, %v3389_v42  ;;  %v3587_v36 = vmul.f32 %v1654_v28, %v3074_v9 }
 0x4cf   :  { %v1946_v1 = vsel %vm3774_vm2, %v1942_v62, %v1936_v54  ;;  %v1945_v21 = vsel %vm3776_vm4, %v1936_v54, %v1938_v55 }
 0x4d0   :  { %v1950_v22 = vadd.f32 %v1946_v1, %v1934_v37  ;;  %v1947_v35 = vadd.f32 %v1945_v21, %v1931_v12 }
 0x4d2   :  { %v1940_v27 = vpop.permute.xlu1 %1939  ;;  %v1954_v26 = vpop.permute.xlu0 %1953 }
 0x4d3   :  { %v1943_v41 = vsel %vm3775_vm11, %v1940_v27, %v1942_v62  ;;  %v1944_v29 = vsel %vm3777_vm6, %v1938_v55, %v1940_v27 }
 0x4d4   :  { %v1949_v62 = vadd.f32 %v1943_v41, %v1933_v31  ;;  %v1948_v8 = vadd.f32 %v1944_v29, %v1932_v4  ;;  %v1668_v41 = vmul.f32 %v3587_v36, %v3587_v36 }
 0x4d6   :  { %v1952_v57 = vpop.permute.xlu1 %1951  ;;  %v1968_v34 = vpop.permute.xlu0 %1967 }
 0x4d7   :  { %v1961_v54 = vsel %vm668_vm7, %v1952_v57, %v1954_v26 }
 0x4d8   :  { %v1963_v16 = vadd.f32 %v1961_v54, %v1947_v35 }
 0x4da   :  { %v1956_v19 = vpop.permute.xlu1 %1955  ;;  %v1972_v50 = vpop.permute.xlu0 %1971 }
 0x4db   :  { %v1960_v13 = vsel %vm668_vm7, %v1954_v26, %v1956_v19 }
 0x4dc   :  { %v1964_v59 = vadd.f32 %v1960_v13, %v1948_v8 }
 0x4de   :  { %v1958_v32 = vpop.permute.xlu1 %1957  ;;  %v1984_v47 = vpop.permute.xlu0 %1983 }
 0x4df   :  { %v1959_v33 = vsel %vm668_vm7, %v1956_v19, %v1958_v32  ;;  %v1962_v42 = vsel %vm668_vm7, %v1958_v32, %v1952_v57  ;;  %vm3778_vm7 = vmmov %vm3765_vm5 }
 0x4e0   :  { %v1965_v30 = vadd.f32 %v1959_v33, %v1949_v62  ;;  %v1966_v55 = vadd.f32 %v1962_v42, %v1950_v22 }
 0x4e2   :  { %v1970_v44 = vpop.permute.xlu1 %1969  ;;  %v1988_v18 = vpop.permute.xlu0 %1987 }
 0x4e3   :  { %v1976_v27 = vsel %vm685_vm8, %v1970_v44, %v1972_v50  ;;  %v1977_v0 = vsel %vm685_vm8, %v1968_v34, %v1970_v44 }
 0x4e4   :  { %v1979_v48 = vadd.f32 %v1977_v0, %v1963_v16  ;;  %v1980_v60 = vadd.f32 %v1976_v27, %v1964_v59 }
 0x4e6   :  { %v1974_v7 = vpop.permute.xlu1 %1973  ;;  %v1990_v43 = vpop.permute.xlu0 %1989 }
 0x4e7   :  { %v1975_v52 = vsel %vm685_vm8, %v1972_v50, %v1974_v7  ;;  %v1978_v57 = vsel %vm685_vm8, %v1974_v7, %v1968_v34  ;;  %v1991_v26 = vsel %vm3765_vm5, %v1988_v18, %v1990_v43  ;;  %v1994_v3 = vsel %vm3778_vm7, %v1990_v43, %v1984_v47  ;;  %vm3779_vm8 = vmmov %vm3765_vm5 }
 0x4e8   :  { %v1981_v61 = vadd.f32 %v1975_v52, %v1965_v30  ;;  %v1982_v17 = vadd.f32 %v1978_v57, %v1966_v55  ;;  %v1653_v34 = vadd.f32 %v3425_v56, %v3505_v51 }
 0x4ea   :  { %v1997_v19 = vadd.f32 %v1991_v26, %v1981_v61  ;;  %v1986_v50 = vpop.permute.xlu1 %1985  ;;  %v1998_v39 = vadd.f32 %v1994_v3, %v1982_v17  ;;  %v1657_v51 = vmul.f32 %v1653_v34, %v3057_v58  ;;  %v2028_v3 = vld [vmem:[%s3661_s9] sm:$0xff] }
 0x4eb   :  { %v1992_v6 = vsel %vm3779_vm8, %v1986_v50, %v1988_v18  ;;  %v1993_v25 = vsel %vm3780_vm15, %v1984_v47, %v1986_v50  ;;  %v2032_v34 = vld [vmem:[%s3662_s10] sm:$0xff] }
 0x4ec   :  { %v1995_v14 = vadd.f32 %v1993_v25, %v1979_v48  ;;  %v1996_v24 = vadd.f32 %v1992_v6, %v1980_v60  ;;  %v2001_v5 = vadd.f32 %v1997_v19, %v3425_v56  ;;  %v2002_v63 = vadd.f32 %v1998_v39, %v3425_v56 }
 0x4ed   :  { %v1667_v44 = vmul.f32 %v1657_v51, %v1657_v51 }
 0x4ee   :  { %v1999_v46 = vadd.f32 %v1995_v14, %v3425_v56  ;;  %v2000_v23 = vadd.f32 %v1996_v24, %v3425_v56  ;;  %v1639_v2 = vpop.permute.xlu1 %1638  ;;  %v2005_v1 = vmul.f32 %v2001_v5, %v3127_v45  ;;  %v2006_v29 = vmul.f32 %v2002_v63, %v3133_v38 }
 0x4ef   :  { %v1640_v40 = vsel %vm3781_vm13, %v3507_v53, %v1639_v2  ;;  %v1643_v32 = vsel %vm3782_vm14, %v1639_v2, %v3500_v49  ;;  %v1661_v49 = vadd.f32 %v3587_v36, %v1657_v51  ;;  %v1671_v42 = vadd.f32 %v1668_v41, %v1667_v44 }
 0x4f0   :  { %v2003_v47 = vmul.f32 %v1999_v46, %v3057_v58  ;;  %v2004_v15 = vmul.f32 %v2000_v23, %v3074_v9  ;;  %v1646_v37 = vadd.f32 %v1640_v40, %v3496_v11  ;;  %v1647_v12 = vadd.f32 %v1643_v32, %v3498_v10 }
 0x4f1   :  { %v2015_v54 = vmul.f32 %v2005_v1, %v2005_v1  ;;  %v2016_v27 = vmul.f32 %v2006_v29, %v2006_v29 }
 0x4f2   :  { %v1655_v21 = vadd.f32 %v3425_v56, %v1646_v37  ;;  %v1656_v53 = vadd.f32 %v3425_v56, %v1647_v12  ;;  %v2007_v31 = vadd.f32 %v2004_v15, %v2003_v47  ;;  %v2013_v20 = vmul.f32 %v2003_v47, %v2003_v47 }
 0x4f3   :  { %v2014_v18 = vmul.f32 %v2004_v15, %v2004_v15 }
 0x4f4   :  { %v1659_v11 = vmul.f32 %v1655_v21, %v3127_v45  ;;  %v1660_v10 = vmul.f32 %v1656_v53, %v3133_v38  ;;  %v2008_v33 = vadd.f32 %v2007_v31, %v2005_v1 }
 0x4f5   :  { %v2017_v22 = vadd.f32 %v2014_v18, %v2013_v20 }
 0x4f6   :  { %v2009_v4 = vadd.f32 %v2008_v33, %v2006_v29  ;;  %v1662_v62 = vadd.f32 %v1661_v49, %v1659_v11  ;;  %v1669_v35 = vmul.f32 %v1659_v11, %v1659_v11  ;;  %v1670_v13 = vmul.f32 %v1660_v10, %v1660_v10 }
 0x4f7   :  { %v2018_v30 = vadd.f32 %v2017_v22, %v2015_v54 }
 0x4f8   :  { %2010 = vadd.xlane.f32.xlu0 %v2009_v4  ;;  %v1663_v56 = vadd.f32 %v1662_v62, %v1660_v10  ;;  %v1672_v8 = vadd.f32 %v1671_v42, %v1669_v35 }
 0x4f9   :  { %v2019_v7 = vadd.f32 %v2018_v30, %v2016_v27 }
 0x4fa   :  { %1664 = vadd.xlane.f32.xlu1 %v1663_v56  ;;  %v1673_v55 = vadd.f32 %v1672_v8, %v1670_v13 }
 0x4fc   :  { %1674 = vadd.xlane.f32.xlu0 %v1673_v55 }
 0x4fe   :  { %2020 = vadd.xlane.f32.xlu1 %v2019_v7 }
 0x581   :  { %v2011_v43 = vpop.xlane.xlu0 %2010 }
 0x583   :  { %v1665_v0 = vpop.xlane.xlu1 %1664 }
 0x584   :  { %v2012_v52 = vadd.f32 %v2011_v43, %v1665_v0 }
 0x585   :  { %v1675_v26 = vpop.xlane.xlu0 %1674 }
 0x586   :  { %v2023_v57 = vmul.f32 0.0015432099, %v2012_v52 }
 0x587   :  { %v2021_v16 = vpop.xlane.xlu1 %2020 }
 0x588   :  { %v2022_v59 = vadd.f32 %v2021_v16, %v1675_v26  ;;  %v2025_v61 = vmul.f32 %v2023_v57, %v2023_v57 }
 0x58a   :  { %v2024_v17 = vmul.f32 0.0015432099, %v2022_v59 }
 0x58c   :  { %v2026_v28 = vsub.f32 %v2024_v17, %v2025_v61 }
 0x58e   :  { %v2027_v48 = vmax.f32 %v2026_v28, 0.0 }
 0x590   :  { %v2029_v60 = vadd.f32 1e-05, %v2027_v48 }
 0x592   :  { %2246 = vrsqrt.f32 %v2029_v60 }
 0x59f   :  { %v2247_v19 = vpop.eup %2246 }
 0x5a0   :  { %v2031_v50 = vmul.f32 %v2247_v19, %v2028_v3 }
 0x5a2   :  { %2037 = vperm.xlu0 %2211, %v2031_v50   ;;  %v2033_v39 = vmul.f32 %v2031_v50, %v2023_v57 }
 0x5a4   :  { %v2034_v6 = vsub.f32 %v2032_v34, %v2033_v39 }
 0x5a6   :  { %2046 = vperm.xlu1 %2212, %v2034_v6  }
 0x61d   :  { %v2038_v25 = vpop.permute.xlu0 %2037 }
 0x61e   :  { %v2040_v14 = vmul.f32 %v2038_v25, %v1657_v51  ;;  %v2041_v24 = vmul.f32 %v2038_v25, %v3587_v36  ;;  %v2042_v5 = vmul.f32 %v2038_v25, %v1659_v11  ;;  %v2043_v46 = vmul.f32 %v2038_v25, %v1660_v10 }
 0x61f   :  { %v2065_v23 = vmul.f32 %v2038_v25, %v2003_v47  ;;  %v2066_v2 = vmul.f32 %v2038_v25, %v2004_v15  ;;  %v2067_v63 = vmul.f32 %v2038_v25, %v2005_v1  ;;  %v2068_v40 = vmul.f32 %v2038_v25, %v2006_v29 }
 0x621   :  { %v2047_v32 = vpop.permute.xlu1 %2046 }
 0x622   :  { %v2049_v37 = vadd.f32 %v2047_v32, %v2040_v14  ;;  %v2050_v12 = vadd.f32 %v2047_v32, %v2041_v24  ;;  %v2051_v41 = vadd.f32 %v2047_v32, %v2042_v5  ;;  %v2052_v21 = vadd.f32 %v2047_v32, %v2043_v46 }
 0x623   :  { %v2069_v53 = vadd.f32 %v2065_v23, %v2047_v32  ;;  %v2070_v31 = vadd.f32 %v2066_v2, %v2047_v32  ;;  %v2071_v20 = vadd.f32 %v2067_v63, %v2047_v32  ;;  %v2072_v49 = vadd.f32 %v2068_v40, %v2047_v32 }
 0x624   :  { %v2053_v44 = vmax.f32 %v2049_v37, 0.0  ;;  %v2054_v18 = vmax.f32 %v2050_v12, 0.0  ;;  %v2055_v51 = vmax.f32 %v2051_v41, 0.0  ;;  %v2056_v33 = vmax.f32 %v2052_v21, 0.0 }
 0x625   :  { %v2073_v36 = vmax.f32 %v2069_v53, 0.0  ;;  %v2074_v11 = vmax.f32 %v2070_v31, 0.0  ;;  %v2075_v10 = vmax.f32 %v2071_v20, 0.0  ;;  %v2076_v47 = vmax.f32 %v2072_v49, 0.0 }
 0x626   :  { %v2057_v15 = vmul.f32 %v2053_v44, %v3057_v58  ;;  %v2058_v1 = vmul.f32 %v2054_v18, %v3074_v9  ;;  %v2059_v29 = vmul.f32 %v2055_v51, %v3127_v45  ;;  %v2060_v42 = vmul.f32 %v2056_v33, %v3133_v38 }
 0x627   :  { %v2077_v22 = vmul.f32 %v2073_v36, %v3057_v58  ;;  %v2078_v4 = vmul.f32 %v2074_v11, %v3074_v9  ;;  %v2079_v62 = vmul.f32 %v2075_v10, %v3127_v45  ;;  %v2080_v35 = vmul.f32 %v2076_v47, %v3133_v38 }
 0x628   :  { %2061 = vst [vmem:[%s3663_s11] sm:$0xff] %v2057_v15  ;;  %2062 = vst [vmem:[%s3663_s11 + $0x8] sm:$0xff] %v2058_v1 }
 0x629   :  { %2063 = vst [vmem:[%s3663_s11 + $0x10] sm:$0xff] %v2059_v29  ;;  %2064 = vst [vmem:[%s3663_s11 + $0x18] sm:$0xff] %v2060_v42 }
 0x62a   :  { %2197 = vst [vmem:[%s3663_s11 + $0x20] sm:$0xff] %v2077_v22  ;;  %2198 = vst [vmem:[%s3663_s11 + $0x28] sm:$0xff] %v2078_v4 }
 0x62b   :  { %2199 = vst [vmem:[%s3663_s11 + $0x30] sm:$0xff] %v2079_v62  ;;  %2200 = vst [vmem:[%s3663_s11 + $0x38] sm:$0xff] %v2080_v35 }

</bundles_post_ra>
